<compile_context>
chip_gen: v7x
topology: tpu7x:2x2x1
jax: 0.10.0
libtpu: 0.0.40
codegen_flags: <defaults>
</compile_context>

<pallas_src>
import numpy as np
import jax
import jax.numpy as jnp
from jax.experimental import pallas as pl
from jax.experimental.pallas import tpu as pltpu


def lstm_chunk_kernel(x_ref, wih_ref, whh_ref, b_ref, len_ref, y_ref, h_scr, c_scr):
    """One grid step == one chunk of T_CHUNK LSTM timesteps.

    x_ref : (T_CHUNK*B, I)    time-major chunk of inputs (rows t*B .. t*B+B-1 are step t)
    wih   : (I,  4*Hp)        W_ih^T, gate-padded
    whh   : (Hp, 4*Hp)        W_hh^T, gate-padded
    b     : (1,  4*Hp)        b_ih + b_hh, gate-padded
    len   : (B, 1) int32      sequence lengths
    y_ref : (T_CHUNK*B, Hp)   time-major chunk of outputs
    h/c   : (B, Hp) f32       recurrent state, persists across grid steps
    """
    B, Hp = h_scr.shape
    t_chunk = x_ref.shape[0] // B
    c_idx = pl.program_id(0)

    @pl.when(c_idx == 0)
    def _init():
        h_scr[...] = jnp.zeros_like(h_scr)
        c_scr[...] = jnp.zeros_like(c_scr)

    # ---- Hoisted input projection: one MXU matmul for the whole time chunk ----
    gx = jnp.dot(x_ref[...], wih_ref[...], preferred_element_type=jnp.float32)
    gx = gx + b_ref[...]                      # (t_chunk*B, 4*Hp), f32

    whh = whh_ref[...]
    lens = len_ref[...]                       # (B, 1) int32
    t_base = c_idx * t_chunk

    h = h_scr[...]
    c = c_scr[...]

    # ---- Serial recurrence over the chunk (fully unrolled; t_chunk is static) ----
    for t in range(t_chunk):
        gates = gx[t * B:(t + 1) * B, :] + jnp.dot(
            h.astype(whh.dtype), whh, preferred_element_type=jnp.float32)  # (B, 4*Hp)

        # PyTorch gate order: i, f, g, o — each slice is 128-lane aligned.
        i_g = jax.nn.sigmoid(gates[:, 0 * Hp:1 * Hp])
        f_g = jax.nn.sigmoid(gates[:, 1 * Hp:2 * Hp])
        g_g = jnp.tanh(gates[:, 2 * Hp:3 * Hp])
        o_g = jax.nn.sigmoid(gates[:, 3 * Hp:4 * Hp])

        c_new = f_g * c + i_g * g_g
        h_new = o_g * jnp.tanh(c_new)

        valid = lens > (t_base + t)           # (B, 1) packed-sequence mask
        h = jnp.where(valid, h_new, h)
        c = jnp.where(valid, c_new, c)
        y_ref[t * B:(t + 1) * B, :] = jnp.where(valid, h_new, 0.0).astype(y_ref.dtype)

    h_scr[...] = h
    c_scr[...] = c


def dynamic_lstm_forward(x, seq_lens, w_ih, w_hh, b_ih, b_hh,
                         *, t_chunk=8, compute_dtype=jnp.float32):
    """x: [B, T, I] float32; seq_lens: [B] ints (host-known).
    Returns [B, max(seq_lens), H] — identical to the PyTorch module output."""
    B, T, I = x.shape
    H = w_hh.shape[1]

    lens_np = np.asarray(seq_lens)
    t_out = int(lens_np.max()) if lens_np.size else 0
    if t_out == 0:                             # all-empty edge case
        return jnp.zeros((B, 0, H), jnp.float32)

    LANE = 128
    Hp = ((H + LANE - 1) // LANE) * LANE       # lane-aligned hidden size
    n_chunks = pl.cdiv(t_out, t_chunk)
    t_pad = n_chunks * t_chunk

    # ---- weights: transpose to (in, 4H) and pad each gate block to Hp lanes ----
    wih_t = jnp.transpose(w_ih, (1, 0)).astype(jnp.float32)   # (I, 4H)
    whh_t = jnp.transpose(w_hh, (1, 0)).astype(jnp.float32)   # (H, 4H)
    bias = (b_ih + b_hh).astype(jnp.float32)                  # (4H,)

    def pad_gate_cols(w):                      # (..., 4H) -> (..., 4Hp), zero-padded
        lead = w.shape[:-1]
        w4 = w.reshape(lead + (4, H))
        w4 = jnp.pad(w4, [(0, 0)] * len(lead) + [(0, 0), (0, Hp - H)])
        return w4.reshape(lead + (4 * Hp,))

    wih_p = pad_gate_cols(wih_t)                                   # (I, 4Hp)
    whh_p = pad_gate_cols(jnp.pad(whh_t, ((0, Hp - H), (0, 0))))   # (Hp, 4Hp)
    bias_p = pad_gate_cols(bias).reshape(1, 4 * Hp)                # (1, 4Hp)

    # ---- input: time-major, truncated to t_out, zero-padded to t_pad, flattened ----
    x_tm = jnp.transpose(x[:, :t_out, :], (1, 0, 2)).astype(jnp.float32)  # (t_out, B, I)
    x_tm = jnp.pad(x_tm, ((0, t_pad - t_out), (0, 0), (0, 0)))
    x2d = x_tm.reshape(t_pad * B, I)                                      # (t_pad*B, I)

    if compute_dtype != jnp.float32:           # bf16 MXU path (accumulate in f32)
        x2d = x2d.astype(compute_dtype)
        wih_p = wih_p.astype(compute_dtype)
        whh_p = whh_p.astype(compute_dtype)

    lens2d = jnp.asarray(lens_np, dtype=jnp.int32).reshape(B, 1)

    grid_spec = pltpu.PrefetchScalarGridSpec(
        num_scalar_prefetch=0,
        grid=(n_chunks,),
        in_specs=[
            pl.BlockSpec((t_chunk * B, I), lambda c: (c, 0)),   # x chunk slab
            pl.BlockSpec((I, 4 * Hp), lambda c: (0, 0)),        # W_ih^T (resident)
            pl.BlockSpec((Hp, 4 * Hp), lambda c: (0, 0)),       # W_hh^T (resident)
            pl.BlockSpec((1, 4 * Hp), lambda c: (0, 0)),        # bias
            pl.BlockSpec((B, 1), lambda c: (0, 0)),             # seq lens
        ],
        out_specs=pl.BlockSpec((t_chunk * B, Hp), lambda c: (c, 0)),
        scratch_shapes=[
            pltpu.VMEM((B, Hp), jnp.float32),   # h state
            pltpu.VMEM((B, Hp), jnp.float32),   # c state
        ],
    )

    y2d = pl.pallas_call(
        lstm_chunk_kernel,
        out_shape=jax.ShapeDtypeStruct((t_pad * B, Hp), jnp.float32),
        grid_spec=grid_spec,
        compiler_params=pltpu.CompilerParams(
            dimension_semantics=("arbitrary",)),   # time recurrence: sequential axis
    )(x2d, wih_p, whh_p, bias_p, lens2d)

    y = y2d.reshape(t_pad, B, Hp)[:t_out, :, :H]   # drop time & lane padding
    return jnp.transpose(y, (1, 0, 2))             # [B, t_out, H]


def lstm_reference(x, seq_lens, w_ih, w_hh, b_ih, b_hh):
    """Pure-JAX reference with identical packed-sequence semantics (f32)."""
    B, T, I = x.shape
    H = w_hh.shape[1]
    t_out = int(np.asarray(seq_lens).max())
    lens = jnp.asarray(np.asarray(seq_lens), dtype=jnp.int32)

    def step(carry, t):
        h, c = carry
        x_t = x[:, t, :]
        gates = x_t @ w_ih.T + h @ w_hh.T + b_ih + b_hh
        i_g = jax.nn.sigmoid(gates[:, :H])
        f_g = jax.nn.sigmoid(gates[:, H:2 * H])
        g_g = jnp.tanh(gates[:, 2 * H:3 * H])
        o_g = jax.nn.sigmoid(gates[:, 3 * H:])
        c_new = f_g * c + i_g * g_g
        h_new = o_g * jnp.tanh(c_new)
        valid = (lens > t)[:, None]
        h = jnp.where(valid, h_new, h)
        c = jnp.where(valid, c_new, c)
        return (h, c), jnp.where(valid, h_new, 0.0)

    init = (jnp.zeros((B, H), jnp.float32), jnp.zeros((B, H), jnp.float32))
    _, ys = jax.lax.scan(step, init, jnp.arange(t_out))
    return jnp.transpose(ys, (1, 0, 2))


if __name__ == "__main__":
    # Small shapes consistent with the module's forward.
    B, T, I, H = 8, 8, 32, 32

    key = jax.random.PRNGKey(0)
    kx, k1, k2, k3, k4 = jax.random.split(key, 5)

    x = jax.random.normal(kx, (B, T, I), dtype=jnp.float32)
    seq_lens = np.array([6, 3, 5, 2, 6, 4, 1, 6], dtype=np.int32)  # max < T

    # Deterministic init matching nn.LSTM shapes: uniform(-1/sqrt(H), 1/sqrt(H)).
    k_init = 1.0 / np.sqrt(H)
    w_ih = jax.random.uniform(k1, (4 * H, I), jnp.float32, -k_init, k_init)
    w_hh = jax.random.uniform(k2, (4 * H, H), jnp.float32, -k_init, k_init)
    b_ih = jax.random.uniform(k3, (4 * H,), jnp.float32, -k_init, k_init)
    b_hh = jax.random.uniform(k4, (4 * H,), jnp.float32, -k_init, k_init)

    y_ref = jax.block_until_ready(
        lstm_reference(x, seq_lens, w_ih, w_hh, b_ih, b_hh))

    # f32 path: exact semantics of the PyTorch module.
    y = jax.block_until_ready(
        dynamic_lstm_forward(x, seq_lens, w_ih, w_hh, b_ih, b_hh))
    assert y.shape == (B, int(seq_lens.max()), H), y.shape
    np.testing.assert_allclose(np.asarray(y), np.asarray(y_ref),
                               rtol=1e-5, atol=1e-5)

    # bf16 MXU path (f32 accumulation + f32 gate math): looser tolerance.
    y_bf16 = jax.block_until_ready(
        dynamic_lstm_forward(x, seq_lens, w_ih, w_hh, b_ih, b_hh,
                             compute_dtype=jnp.bfloat16))
    np.testing.assert_allclose(np.asarray(y_bf16), np.asarray(y_ref),
                               rtol=5e-2, atol=5e-2)

    print("KERNEL_OK")
</pallas_src>

<mosaic_0001>
module attributes {stable_mosaic.version = 11 : i64} {
  func.func @lstm_chunk_kernel(%arg0: i32, %arg1: memref<64x32xf32, #tpu.memory_space<vmem>>, %arg2: memref<32x512xf32, #tpu.memory_space<vmem>>, %arg3: memref<128x512xf32, #tpu.memory_space<vmem>>, %arg4: memref<1x512xf32, #tpu.memory_space<vmem>>, %arg5: memref<8x1xi32, #tpu.memory_space<vmem>>, %arg6: memref<64x128xf32, #tpu.memory_space<vmem>>, %arg7: memref<8x128xf32, #tpu.memory_space<vmem>>, %arg8: memref<8x128xf32, #tpu.memory_space<vmem>>) attributes {dimension_semantics = [#tpu.dimension_semantics<arbitrary>], iteration_bounds = array<i64: 1>, scalar_prefetch = 0 : i64, scratch_operands = 2 : i64, tpu.core_type = #tpu.core_type<tc>, window_params = [{transform_indices = @transform_0, window_bounds = array<i64: 64, 32>}, {pipeline_mode = #tpu.pipeline_mode<synchronous>, transform_indices = @transform_1, window_bounds = array<i64: 32, 512>}, {pipeline_mode = #tpu.pipeline_mode<synchronous>, transform_indices = @transform_2, window_bounds = array<i64: 128, 512>}, {pipeline_mode = #tpu.pipeline_mode<synchronous>, transform_indices = @transform_3, window_bounds = array<i64: 1, 512>}, {pipeline_mode = #tpu.pipeline_mode<synchronous>, transform_indices = @transform_4, window_bounds = array<i64: 8, 1>}, {transform_indices = @transform_5, window_bounds = array<i64: 64, 128>}]} {
    %c0_i32 = arith.constant 0 : i32
    %0 = arith.cmpi eq, %arg0, %c0_i32 : i32
    %1 = arith.extui %0 : i1 to i32
    %c0_i32_0 = arith.constant 0 : i32
    %2 = arith.cmpi ne, %1, %c0_i32_0 : i32
    scf.if %2 {
      %cst_68 = arith.constant 0.000000e+00 : f32
      %352 = vector.broadcast %cst_68 : f32 to vector<8x128xf32>
      %c0_69 = arith.constant 0 : index
      %c0_70 = arith.constant 0 : index
      %353 = vector.load %arg7[%c0_69, %c0_70] : memref<8x128xf32, #tpu.memory_space<vmem>>, vector<8x128xf32>
      tpu.vector_store %arg7[%c0_69, %c0_70], %352 {strides = array<i32>} : memref<8x128xf32, #tpu.memory_space<vmem>>, vector<8x128xf32>,
      %cst_71 = arith.constant 0.000000e+00 : f32
      %354 = vector.broadcast %cst_71 : f32 to vector<8x128xf32>
      %c0_72 = arith.constant 0 : index
      %c0_73 = arith.constant 0 : index
      %355 = vector.load %arg8[%c0_72, %c0_73] : memref<8x128xf32, #tpu.memory_space<vmem>>, vector<8x128xf32>
      tpu.vector_store %arg8[%c0_72, %c0_73], %354 {strides = array<i32>} : memref<8x128xf32, #tpu.memory_space<vmem>>, vector<8x128xf32>,
    } else {
    }
    %c0 = arith.constant 0 : index
    %c0_1 = arith.constant 0 : index
    %3 = vector.load %arg1[%c0, %c0_1] : memref<64x32xf32, #tpu.memory_space<vmem>>, vector<64x32xf32>
    %c0_2 = arith.constant 0 : index
    %c0_3 = arith.constant 0 : index
    %4 = vector.load %arg2[%c0_2, %c0_3] : memref<32x512xf32, #tpu.memory_space<vmem>>, vector<32x512xf32>
    %cst = arith.constant dense<0.000000e+00> : vector<64x512xf32>
    %5 = tpu.matmul %3, %4, %cst {dimension_numbers = #tpu.dot_dimension_numbers<[1], [0], [0], [1], [0, 0, 1, 1], [], []>} : vector<64x32xf32>, vector<32x512xf32>, vector<64x512xf32> -> vector<64x512xf32>
    %c0_4 = arith.constant 0 : index
    %c0_5 = arith.constant 0 : index
    %6 = vector.load %arg4[%c0_4, %c0_5] : memref<1x512xf32, #tpu.memory_space<vmem>>, vector<1x512xf32>
    %7 = vector.broadcast %6 : vector<1x512xf32> to vector<64x512xf32>
    %8 = arith.addf %5, %7 : vector<64x512xf32>
    %c0_6 = arith.constant 0 : index
    %c0_7 = arith.constant 0 : index
    %9 = vector.load %arg3[%c0_6, %c0_7] : memref<128x512xf32, #tpu.memory_space<vmem>>, vector<128x512xf32>
    %c0_8 = arith.constant 0 : index
    %c0_9 = arith.constant 0 : index
    %10 = vector.load %arg5[%c0_8, %c0_9] : memref<8x1xi32, #tpu.memory_space<vmem>>, vector<8x1xi32>
    %c8_i32 = arith.constant 8 : i32
    %11 = arith.muli %arg0, %c8_i32 : i32
    %c0_10 = arith.constant 0 : index
    %c0_11 = arith.constant 0 : index
    %12 = vector.load %arg7[%c0_10, %c0_11] : memref<8x128xf32, #tpu.memory_space<vmem>>, vector<8x128xf32>
    %c0_12 = arith.constant 0 : index
    %c0_13 = arith.constant 0 : index
    %13 = vector.load %arg8[%c0_12, %c0_13] : memref<8x128xf32, #tpu.memory_space<vmem>>, vector<8x128xf32>
    %14 = vector.extract_strided_slice %8 {offsets = [0, 0], sizes = [8, 512], strides = [1, 1]} : vector<64x512xf32> to vector<8x512xf32>
    %cst_14 = arith.constant dense<0.000000e+00> : vector<8x512xf32>
    %15 = tpu.matmul %12, %9, %cst_14 {dimension_numbers = #tpu.dot_dimension_numbers<[1], [0], [0], [1], [0, 0, 1, 1], [], []>} : vector<8x128xf32>, vector<128x512xf32>, vector<8x512xf32> -> vector<8x512xf32>
    %16 = arith.addf %14, %15 : vector<8x512xf32>
    %17 = vector.extract_strided_slice %16 {offsets = [0, 0], sizes = [8, 128], strides = [1, 1]} : vector<8x512xf32> to vector<8x128xf32>
    %18 = arith.negf %17 : vector<8x128xf32>
    %19 = math.exp %18 : vector<8x128xf32>
    %cst_15 = arith.constant 1.000000e+00 : f32
    %20 = vector.broadcast %cst_15 : f32 to vector<8x128xf32>
    %21 = arith.addf %20, %19 : vector<8x128xf32>
    %22 = arith.divf %20, %21 : vector<8x128xf32>
    %23 = vector.extract_strided_slice %16 {offsets = [0, 128], sizes = [8, 128], strides = [1, 1]} : vector<8x512xf32> to vector<8x128xf32>
    %24 = arith.negf %23 : vector<8x128xf32>
    %25 = math.exp %24 : vector<8x128xf32>
    %cst_16 = arith.constant 1.000000e+00 : f32
    %26 = vector.broadcast %cst_16 : f32 to vector<8x128xf32>
    %27 = arith.addf %26, %25 : vector<8x128xf32>
    %28 = arith.divf %26, %27 : vector<8x128xf32>
    %29 = vector.extract_strided_slice %16 {offsets = [0, 256], sizes = [8, 128], strides = [1, 1]} : vector<8x512xf32> to vector<8x128xf32>
    %30 = math.tanh %29 : vector<8x128xf32>
    %31 = vector.extract_strided_slice %16 {offsets = [0, 384], sizes = [8, 128], strides = [1, 1]} : vector<8x512xf32> to vector<8x128xf32>
    %32 = arith.negf %31 : vector<8x128xf32>
    %33 = math.exp %32 : vector<8x128xf32>
    %cst_17 = arith.constant 1.000000e+00 : f32
    %34 = vector.broadcast %cst_17 : f32 to vector<8x128xf32>
    %35 = arith.addf %34, %33 : vector<8x128xf32>
    %36 = arith.divf %34, %35 : vector<8x128xf32>
    %37 = arith.mulf %28, %13 : vector<8x128xf32>
    %38 = arith.mulf %22, %30 : vector<8x128xf32>
    %39 = arith.addf %37, %38 : vector<8x128xf32>
    %40 = math.tanh %39 : vector<8x128xf32>
    %41 = arith.mulf %36, %40 : vector<8x128xf32>
    %c0_i32_18 = arith.constant 0 : i32
    %42 = arith.addi %11, %c0_i32_18 : i32
    %43 = vector.broadcast %42 : i32 to vector<8x1xi32>
    %44 = arith.cmpi sgt, %10, %43 : vector<8x1xi32>
    %45 = vector.shape_cast %44 : vector<8x1xi1> to vector<8x1xi1>
    %46 = vector.broadcast %45 : vector<8x1xi1> to vector<8x128xi1>
    %47 = arith.select %46, %41, %12 : vector<8x128xi1>, vector<8x128xf32>
    %48 = vector.shape_cast %44 : vector<8x1xi1> to vector<8x1xi1>
    %49 = vector.broadcast %48 : vector<8x1xi1> to vector<8x128xi1>
    %50 = arith.select %49, %39, %13 : vector<8x128xi1>, vector<8x128xf32>
    %cst_19 = arith.constant 0.000000e+00 : f32
    %51 = vector.shape_cast %44 : vector<8x1xi1> to vector<8x1xi1>
    %52 = vector.broadcast %51 : vector<8x1xi1> to vector<8x128xi1>
    %53 = vector.broadcast %cst_19 : f32 to vector<8x128xf32>
    %54 = arith.select %52, %41, %53 : vector<8x128xi1>, vector<8x128xf32>
    %c0_20 = arith.constant 0 : index
    %c0_21 = arith.constant 0 : index
    %55 = vector.load %arg6[%c0_20, %c0_21] : memref<64x128xf32, #tpu.memory_space<vmem>>, vector<8x128xf32>
    tpu.vector_store %arg6[%c0_20, %c0_21], %54 {strides = array<i32>} : memref<64x128xf32, #tpu.memory_space<vmem>>, vector<8x128xf32>,
    %56 = vector.extract_strided_slice %8 {offsets = [8, 0], sizes = [8, 512], strides = [1, 1]} : vector<64x512xf32> to vector<8x512xf32>
    %cst_22 = arith.constant dense<0.000000e+00> : vector<8x512xf32>
    %57 = tpu.matmul %47, %9, %cst_22 {dimension_numbers = #tpu.dot_dimension_numbers<[1], [0], [0], [1], [0, 0, 1, 1], [], []>} : vector<8x128xf32>, vector<128x512xf32>, vector<8x512xf32> -> vector<8x512xf32>
    %58 = arith.addf %56, %57 : vector<8x512xf32>
    %59 = vector.extract_strided_slice %58 {offsets = [0, 0], sizes = [8, 128], strides = [1, 1]} : vector<8x512xf32> to vector<8x128xf32>
    %60 = arith.negf %59 : vector<8x128xf32>
    %61 = math.exp %60 : vector<8x128xf32>
    %cst_23 = arith.constant 1.000000e+00 : f32
    %62 = vector.broadcast %cst_23 : f32 to vector<8x128xf32>
    %63 = arith.addf %62, %61 : vector<8x128xf32>
    %64 = arith.divf %62, %63 : vector<8x128xf32>
    %65 = vector.extract_strided_slice %58 {offsets = [0, 128], sizes = [8, 128], strides = [1, 1]} : vector<8x512xf32> to vector<8x128xf32>
    %66 = arith.negf %65 : vector<8x128xf32>
    %67 = math.exp %66 : vector<8x128xf32>
    %cst_24 = arith.constant 1.000000e+00 : f32
    %68 = vector.broadcast %cst_24 : f32 to vector<8x128xf32>
    %69 = arith.addf %68, %67 : vector<8x128xf32>
    %70 = arith.divf %68, %69 : vector<8x128xf32>
    %71 = vector.extract_strided_slice %58 {offsets = [0, 256], sizes = [8, 128], strides = [1, 1]} : vector<8x512xf32> to vector<8x128xf32>
    %72 = math.tanh %71 : vector<8x128xf32>
    %73 = vector.extract_strided_slice %58 {offsets = [0, 384], sizes = [8, 128], strides = [1, 1]} : vector<8x512xf32> to vector<8x128xf32>
    %74 = arith.negf %73 : vector<8x128xf32>
    %75 = math.exp %74 : vector<8x128xf32>
    %cst_25 = arith.constant 1.000000e+00 : f32
    %76 = vector.broadcast %cst_25 : f32 to vector<8x128xf32>
    %77 = arith.addf %76, %75 : vector<8x128xf32>
    %78 = arith.divf %76, %77 : vector<8x128xf32>
    %79 = arith.mulf %70, %50 : vector<8x128xf32>
    %80 = arith.mulf %64, %72 : vector<8x128xf32>
    %81 = arith.addf %79, %80 : vector<8x128xf32>
    %82 = math.tanh %81 : vector<8x128xf32>
    %83 = arith.mulf %78, %82 : vector<8x128xf32>
    %c1_i32 = arith.constant 1 : i32
    %84 = arith.addi %11, %c1_i32 : i32
    %85 = vector.broadcast %84 : i32 to vector<8x1xi32>
    %86 = arith.cmpi sgt, %10, %85 : vector<8x1xi32>
    %87 = vector.shape_cast %86 : vector<8x1xi1> to vector<8x1xi1>
    %88 = vector.broadcast %87 : vector<8x1xi1> to vector<8x128xi1>
    %89 = arith.select %88, %83, %47 : vector<8x128xi1>, vector<8x128xf32>
    %90 = vector.shape_cast %86 : vector<8x1xi1> to vector<8x1xi1>
    %91 = vector.broadcast %90 : vector<8x1xi1> to vector<8x128xi1>
    %92 = arith.select %91, %81, %50 : vector<8x128xi1>, vector<8x128xf32>
    %cst_26 = arith.constant 0.000000e+00 : f32
    %93 = vector.shape_cast %86 : vector<8x1xi1> to vector<8x1xi1>
    %94 = vector.broadcast %93 : vector<8x1xi1> to vector<8x128xi1>
    %95 = vector.broadcast %cst_26 : f32 to vector<8x128xf32>
    %96 = arith.select %94, %83, %95 : vector<8x128xi1>, vector<8x128xf32>
    %c8 = arith.constant 8 : index
    %c0_27 = arith.constant 0 : index
    %97 = vector.load %arg6[%c8, %c0_27] : memref<64x128xf32, #tpu.memory_space<vmem>>, vector<8x128xf32>
    tpu.vector_store %arg6[%c8, %c0_27], %96 {strides = array<i32>} : memref<64x128xf32, #tpu.memory_space<vmem>>, vector<8x128xf32>,
    %98 = vector.extract_strided_slice %8 {offsets = [16, 0], sizes = [8, 512], strides = [1, 1]} : vector<64x512xf32> to vector<8x512xf32>
    %cst_28 = arith.constant dense<0.000000e+00> : vector<8x512xf32>
    %99 = tpu.matmul %89, %9, %cst_28 {dimension_numbers = #tpu.dot_dimension_numbers<[1], [0], [0], [1], [0, 0, 1, 1], [], []>} : vector<8x128xf32>, vector<128x512xf32>, vector<8x512xf32> -> vector<8x512xf32>
    %100 = arith.addf %98, %99 : vector<8x512xf32>
    %101 = vector.extract_strided_slice %100 {offsets = [0, 0], sizes = [8, 128], strides = [1, 1]} : vector<8x512xf32> to vector<8x128xf32>
    %102 = arith.negf %101 : vector<8x128xf32>
    %103 = math.exp %102 : vector<8x128xf32>
    %cst_29 = arith.constant 1.000000e+00 : f32
    %104 = vector.broadcast %cst_29 : f32 to vector<8x128xf32>
    %105 = arith.addf %104, %103 : vector<8x128xf32>
    %106 = arith.divf %104, %105 : vector<8x128xf32>
    %107 = vector.extract_strided_slice %100 {offsets = [0, 128], sizes = [8, 128], strides = [1, 1]} : vector<8x512xf32> to vector<8x128xf32>
    %108 = arith.negf %107 : vector<8x128xf32>
    %109 = math.exp %108 : vector<8x128xf32>
    %cst_30 = arith.constant 1.000000e+00 : f32
    %110 = vector.broadcast %cst_30 : f32 to vector<8x128xf32>
    %111 = arith.addf %110, %109 : vector<8x128xf32>
    %112 = arith.divf %110, %111 : vector<8x128xf32>
    %113 = vector.extract_strided_slice %100 {offsets = [0, 256], sizes = [8, 128], strides = [1, 1]} : vector<8x512xf32> to vector<8x128xf32>
    %114 = math.tanh %113 : vector<8x128xf32>
    %115 = vector.extract_strided_slice %100 {offsets = [0, 384], sizes = [8, 128], strides = [1, 1]} : vector<8x512xf32> to vector<8x128xf32>
    %116 = arith.negf %115 : vector<8x128xf32>
    %117 = math.exp %116 : vector<8x128xf32>
    %cst_31 = arith.constant 1.000000e+00 : f32
    %118 = vector.broadcast %cst_31 : f32 to vector<8x128xf32>
    %119 = arith.addf %118, %117 : vector<8x128xf32>
    %120 = arith.divf %118, %119 : vector<8x128xf32>
    %121 = arith.mulf %112, %92 : vector<8x128xf32>
    %122 = arith.mulf %106, %114 : vector<8x128xf32>
    %123 = arith.addf %121, %122 : vector<8x128xf32>
    %124 = math.tanh %123 : vector<8x128xf32>
    %125 = arith.mulf %120, %124 : vector<8x128xf32>
    %c2_i32 = arith.constant 2 : i32
    %126 = arith.addi %11, %c2_i32 : i32
    %127 = vector.broadcast %126 : i32 to vector<8x1xi32>
    %128 = arith.cmpi sgt, %10, %127 : vector<8x1xi32>
    %129 = vector.shape_cast %128 : vector<8x1xi1> to vector<8x1xi1>
    %130 = vector.broadcast %129 : vector<8x1xi1> to vector<8x128xi1>
    %131 = arith.select %130, %125, %89 : vector<8x128xi1>, vector<8x128xf32>
    %132 = vector.shape_cast %128 : vector<8x1xi1> to vector<8x1xi1>
    %133 = vector.broadcast %132 : vector<8x1xi1> to vector<8x128xi1>
    %134 = arith.select %133, %123, %92 : vector<8x128xi1>, vector<8x128xf32>
    %cst_32 = arith.constant 0.000000e+00 : f32
    %135 = vector.shape_cast %128 : vector<8x1xi1> to vector<8x1xi1>
    %136 = vector.broadcast %135 : vector<8x1xi1> to vector<8x128xi1>
    %137 = vector.broadcast %cst_32 : f32 to vector<8x128xf32>
    %138 = arith.select %136, %125, %137 : vector<8x128xi1>, vector<8x128xf32>
    %c16 = arith.constant 16 : index
    %c0_33 = arith.constant 0 : index
    %139 = vector.load %arg6[%c16, %c0_33] : memref<64x128xf32, #tpu.memory_space<vmem>>, vector<8x128xf32>
    tpu.vector_store %arg6[%c16, %c0_33], %138 {strides = array<i32>} : memref<64x128xf32, #tpu.memory_space<vmem>>, vector<8x128xf32>,
    %140 = vector.extract_strided_slice %8 {offsets = [24, 0], sizes = [8, 512], strides = [1, 1]} : vector<64x512xf32> to vector<8x512xf32>
    %cst_34 = arith.constant dense<0.000000e+00> : vector<8x512xf32>
    %141 = tpu.matmul %131, %9, %cst_34 {dimension_numbers = #tpu.dot_dimension_numbers<[1], [0], [0], [1], [0, 0, 1, 1], [], []>} : vector<8x128xf32>, vector<128x512xf32>, vector<8x512xf32> -> vector<8x512xf32>
    %142 = arith.addf %140, %141 : vector<8x512xf32>
    %143 = vector.extract_strided_slice %142 {offsets = [0, 0], sizes = [8, 128], strides = [1, 1]} : vector<8x512xf32> to vector<8x128xf32>
    %144 = arith.negf %143 : vector<8x128xf32>
    %145 = math.exp %144 : vector<8x128xf32>
    %cst_35 = arith.constant 1.000000e+00 : f32
    %146 = vector.broadcast %cst_35 : f32 to vector<8x128xf32>
    %147 = arith.addf %146, %145 : vector<8x128xf32>
    %148 = arith.divf %146, %147 : vector<8x128xf32>
    %149 = vector.extract_strided_slice %142 {offsets = [0, 128], sizes = [8, 128], strides = [1, 1]} : vector<8x512xf32> to vector<8x128xf32>
    %150 = arith.negf %149 : vector<8x128xf32>
    %151 = math.exp %150 : vector<8x128xf32>
    %cst_36 = arith.constant 1.000000e+00 : f32
    %152 = vector.broadcast %cst_36 : f32 to vector<8x128xf32>
    %153 = arith.addf %152, %151 : vector<8x128xf32>
    %154 = arith.divf %152, %153 : vector<8x128xf32>
    %155 = vector.extract_strided_slice %142 {offsets = [0, 256], sizes = [8, 128], strides = [1, 1]} : vector<8x512xf32> to vector<8x128xf32>
    %156 = math.tanh %155 : vector<8x128xf32>
    %157 = vector.extract_strided_slice %142 {offsets = [0, 384], sizes = [8, 128], strides = [1, 1]} : vector<8x512xf32> to vector<8x128xf32>
    %158 = arith.negf %157 : vector<8x128xf32>
    %159 = math.exp %158 : vector<8x128xf32>
    %cst_37 = arith.constant 1.000000e+00 : f32
    %160 = vector.broadcast %cst_37 : f32 to vector<8x128xf32>
    %161 = arith.addf %160, %159 : vector<8x128xf32>
    %162 = arith.divf %160, %161 : vector<8x128xf32>
    %163 = arith.mulf %154, %134 : vector<8x128xf32>
    %164 = arith.mulf %148, %156 : vector<8x128xf32>
    %165 = arith.addf %163, %164 : vector<8x128xf32>
    %166 = math.tanh %165 : vector<8x128xf32>
    %167 = arith.mulf %162, %166 : vector<8x128xf32>
    %c3_i32 = arith.constant 3 : i32
    %168 = arith.addi %11, %c3_i32 : i32
    %169 = vector.broadcast %168 : i32 to vector<8x1xi32>
    %170 = arith.cmpi sgt, %10, %169 : vector<8x1xi32>
    %171 = vector.shape_cast %170 : vector<8x1xi1> to vector<8x1xi1>
    %172 = vector.broadcast %171 : vector<8x1xi1> to vector<8x128xi1>
    %173 = arith.select %172, %167, %131 : vector<8x128xi1>, vector<8x128xf32>
    %174 = vector.shape_cast %170 : vector<8x1xi1> to vector<8x1xi1>
    %175 = vector.broadcast %174 : vector<8x1xi1> to vector<8x128xi1>
    %176 = arith.select %175, %165, %134 : vector<8x128xi1>, vector<8x128xf32>
    %cst_38 = arith.constant 0.000000e+00 : f32
    %177 = vector.shape_cast %170 : vector<8x1xi1> to vector<8x1xi1>
    %178 = vector.broadcast %177 : vector<8x1xi1> to vector<8x128xi1>
    %179 = vector.broadcast %cst_38 : f32 to vector<8x128xf32>
    %180 = arith.select %178, %167, %179 : vector<8x128xi1>, vector<8x128xf32>
    %c24 = arith.constant 24 : index
    %c0_39 = arith.constant 0 : index
    %181 = vector.load %arg6[%c24, %c0_39] : memref<64x128xf32, #tpu.memory_space<vmem>>, vector<8x128xf32>
    tpu.vector_store %arg6[%c24, %c0_39], %180 {strides = array<i32>} : memref<64x128xf32, #tpu.memory_space<vmem>>, vector<8x128xf32>,
    %182 = vector.extract_strided_slice %8 {offsets = [32, 0], sizes = [8, 512], strides = [1, 1]} : vector<64x512xf32> to vector<8x512xf32>
    %cst_40 = arith.constant dense<0.000000e+00> : vector<8x512xf32>
    %183 = tpu.matmul %173, %9, %cst_40 {dimension_numbers = #tpu.dot_dimension_numbers<[1], [0], [0], [1], [0, 0, 1, 1], [], []>} : vector<8x128xf32>, vector<128x512xf32>, vector<8x512xf32> -> vector<8x512xf32>
    %184 = arith.addf %182, %183 : vector<8x512xf32>
    %185 = vector.extract_strided_slice %184 {offsets = [0, 0], sizes = [8, 128], strides = [1, 1]} : vector<8x512xf32> to vector<8x128xf32>
    %186 = arith.negf %185 : vector<8x128xf32>
    %187 = math.exp %186 : vector<8x128xf32>
    %cst_41 = arith.constant 1.000000e+00 : f32
    %188 = vector.broadcast %cst_41 : f32 to vector<8x128xf32>
    %189 = arith.addf %188, %187 : vector<8x128xf32>
    %190 = arith.divf %188, %189 : vector<8x128xf32>
    %191 = vector.extract_strided_slice %184 {offsets = [0, 128], sizes = [8, 128], strides = [1, 1]} : vector<8x512xf32> to vector<8x128xf32>
    %192 = arith.negf %191 : vector<8x128xf32>
    %193 = math.exp %192 : vector<8x128xf32>
    %cst_42 = arith.constant 1.000000e+00 : f32
    %194 = vector.broadcast %cst_42 : f32 to vector<8x128xf32>
    %195 = arith.addf %194, %193 : vector<8x128xf32>
    %196 = arith.divf %194, %195 : vector<8x128xf32>
    %197 = vector.extract_strided_slice %184 {offsets = [0, 256], sizes = [8, 128], strides = [1, 1]} : vector<8x512xf32> to vector<8x128xf32>
    %198 = math.tanh %197 : vector<8x128xf32>
    %199 = vector.extract_strided_slice %184 {offsets = [0, 384], sizes = [8, 128], strides = [1, 1]} : vector<8x512xf32> to vector<8x128xf32>
    %200 = arith.negf %199 : vector<8x128xf32>
    %201 = math.exp %200 : vector<8x128xf32>
    %cst_43 = arith.constant 1.000000e+00 : f32
    %202 = vector.broadcast %cst_43 : f32 to vector<8x128xf32>
    %203 = arith.addf %202, %201 : vector<8x128xf32>
    %204 = arith.divf %202, %203 : vector<8x128xf32>
    %205 = arith.mulf %196, %176 : vector<8x128xf32>
    %206 = arith.mulf %190, %198 : vector<8x128xf32>
    %207 = arith.addf %205, %206 : vector<8x128xf32>
    %208 = math.tanh %207 : vector<8x128xf32>
    %209 = arith.mulf %204, %208 : vector<8x128xf32>
    %c4_i32 = arith.constant 4 : i32
    %210 = arith.addi %11, %c4_i32 : i32
    %211 = vector.broadcast %210 : i32 to vector<8x1xi32>
    %212 = arith.cmpi sgt, %10, %211 : vector<8x1xi32>
    %213 = vector.shape_cast %212 : vector<8x1xi1> to vector<8x1xi1>
    %214 = vector.broadcast %213 : vector<8x1xi1> to vector<8x128xi1>
    %215 = arith.select %214, %209, %173 : vector<8x128xi1>, vector<8x128xf32>
    %216 = vector.shape_cast %212 : vector<8x1xi1> to vector<8x1xi1>
    %217 = vector.broadcast %216 : vector<8x1xi1> to vector<8x128xi1>
    %218 = arith.select %217, %207, %176 : vector<8x128xi1>, vector<8x128xf32>
    %cst_44 = arith.constant 0.000000e+00 : f32
    %219 = vector.shape_cast %212 : vector<8x1xi1> to vector<8x1xi1>
    %220 = vector.broadcast %219 : vector<8x1xi1> to vector<8x128xi1>
    %221 = vector.broadcast %cst_44 : f32 to vector<8x128xf32>
    %222 = arith.select %220, %209, %221 : vector<8x128xi1>, vector<8x128xf32>
    %c32 = arith.constant 32 : index
    %c0_45 = arith.constant 0 : index
    %223 = vector.load %arg6[%c32, %c0_45] : memref<64x128xf32, #tpu.memory_space<vmem>>, vector<8x128xf32>
    tpu.vector_store %arg6[%c32, %c0_45], %222 {strides = array<i32>} : memref<64x128xf32, #tpu.memory_space<vmem>>, vector<8x128xf32>,
    %224 = vector.extract_strided_slice %8 {offsets = [40, 0], sizes = [8, 512], strides = [1, 1]} : vector<64x512xf32> to vector<8x512xf32>
    %cst_46 = arith.constant dense<0.000000e+00> : vector<8x512xf32>
    %225 = tpu.matmul %215, %9, %cst_46 {dimension_numbers = #tpu.dot_dimension_numbers<[1], [0], [0], [1], [0, 0, 1, 1], [], []>} : vector<8x128xf32>, vector<128x512xf32>, vector<8x512xf32> -> vector<8x512xf32>
    %226 = arith.addf %224, %225 : vector<8x512xf32>
    %227 = vector.extract_strided_slice %226 {offsets = [0, 0], sizes = [8, 128], strides = [1, 1]} : vector<8x512xf32> to vector<8x128xf32>
    %228 = arith.negf %227 : vector<8x128xf32>
    %229 = math.exp %228 : vector<8x128xf32>
    %cst_47 = arith.constant 1.000000e+00 : f32
    %230 = vector.broadcast %cst_47 : f32 to vector<8x128xf32>
    %231 = arith.addf %230, %229 : vector<8x128xf32>
    %232 = arith.divf %230, %231 : vector<8x128xf32>
    %233 = vector.extract_strided_slice %226 {offsets = [0, 128], sizes = [8, 128], strides = [1, 1]} : vector<8x512xf32> to vector<8x128xf32>
    %234 = arith.negf %233 : vector<8x128xf32>
    %235 = math.exp %234 : vector<8x128xf32>
    %cst_48 = arith.constant 1.000000e+00 : f32
    %236 = vector.broadcast %cst_48 : f32 to vector<8x128xf32>
    %237 = arith.addf %236, %235 : vector<8x128xf32>
    %238 = arith.divf %236, %237 : vector<8x128xf32>
    %239 = vector.extract_strided_slice %226 {offsets = [0, 256], sizes = [8, 128], strides = [1, 1]} : vector<8x512xf32> to vector<8x128xf32>
    %240 = math.tanh %239 : vector<8x128xf32>
    %241 = vector.extract_strided_slice %226 {offsets = [0, 384], sizes = [8, 128], strides = [1, 1]} : vector<8x512xf32> to vector<8x128xf32>
    %242 = arith.negf %241 : vector<8x128xf32>
    %243 = math.exp %242 : vector<8x128xf32>
    %cst_49 = arith.constant 1.000000e+00 : f32
    %244 = vector.broadcast %cst_49 : f32 to vector<8x128xf32>
    %245 = arith.addf %244, %243 : vector<8x128xf32>
    %246 = arith.divf %244, %245 : vector<8x128xf32>
    %247 = arith.mulf %238, %218 : vector<8x128xf32>
    %248 = arith.mulf %232, %240 : vector<8x128xf32>
    %249 = arith.addf %247, %248 : vector<8x128xf32>
    %250 = math.tanh %249 : vector<8x128xf32>
    %251 = arith.mulf %246, %250 : vector<8x128xf32>
    %c5_i32 = arith.constant 5 : i32
    %252 = arith.addi %11, %c5_i32 : i32
    %253 = vector.broadcast %252 : i32 to vector<8x1xi32>
    %254 = arith.cmpi sgt, %10, %253 : vector<8x1xi32>
    %255 = vector.shape_cast %254 : vector<8x1xi1> to vector<8x1xi1>
    %256 = vector.broadcast %255 : vector<8x1xi1> to vector<8x128xi1>
    %257 = arith.select %256, %251, %215 : vector<8x128xi1>, vector<8x128xf32>
    %258 = vector.shape_cast %254 : vector<8x1xi1> to vector<8x1xi1>
    %259 = vector.broadcast %258 : vector<8x1xi1> to vector<8x128xi1>
    %260 = arith.select %259, %249, %218 : vector<8x128xi1>, vector<8x128xf32>
    %cst_50 = arith.constant 0.000000e+00 : f32
    %261 = vector.shape_cast %254 : vector<8x1xi1> to vector<8x1xi1>
    %262 = vector.broadcast %261 : vector<8x1xi1> to vector<8x128xi1>
    %263 = vector.broadcast %cst_50 : f32 to vector<8x128xf32>
    %264 = arith.select %262, %251, %263 : vector<8x128xi1>, vector<8x128xf32>
    %c40 = arith.constant 40 : index
    %c0_51 = arith.constant 0 : index
    %265 = vector.load %arg6[%c40, %c0_51] : memref<64x128xf32, #tpu.memory_space<vmem>>, vector<8x128xf32>
    tpu.vector_store %arg6[%c40, %c0_51], %264 {strides = array<i32>} : memref<64x128xf32, #tpu.memory_space<vmem>>, vector<8x128xf32>,
    %266 = vector.extract_strided_slice %8 {offsets = [48, 0], sizes = [8, 512], strides = [1, 1]} : vector<64x512xf32> to vector<8x512xf32>
    %cst_52 = arith.constant dense<0.000000e+00> : vector<8x512xf32>
    %267 = tpu.matmul %257, %9, %cst_52 {dimension_numbers = #tpu.dot_dimension_numbers<[1], [0], [0], [1], [0, 0, 1, 1], [], []>} : vector<8x128xf32>, vector<128x512xf32>, vector<8x512xf32> -> vector<8x512xf32>
    %268 = arith.addf %266, %267 : vector<8x512xf32>
    %269 = vector.extract_strided_slice %268 {offsets = [0, 0], sizes = [8, 128], strides = [1, 1]} : vector<8x512xf32> to vector<8x128xf32>
    %270 = arith.negf %269 : vector<8x128xf32>
    %271 = math.exp %270 : vector<8x128xf32>
    %cst_53 = arith.constant 1.000000e+00 : f32
    %272 = vector.broadcast %cst_53 : f32 to vector<8x128xf32>
    %273 = arith.addf %272, %271 : vector<8x128xf32>
    %274 = arith.divf %272, %273 : vector<8x128xf32>
    %275 = vector.extract_strided_slice %268 {offsets = [0, 128], sizes = [8, 128], strides = [1, 1]} : vector<8x512xf32> to vector<8x128xf32>
    %276 = arith.negf %275 : vector<8x128xf32>
    %277 = math.exp %276 : vector<8x128xf32>
    %cst_54 = arith.constant 1.000000e+00 : f32
    %278 = vector.broadcast %cst_54 : f32 to vector<8x128xf32>
    %279 = arith.addf %278, %277 : vector<8x128xf32>
    %280 = arith.divf %278, %279 : vector<8x128xf32>
    %281 = vector.extract_strided_slice %268 {offsets = [0, 256], sizes = [8, 128], strides = [1, 1]} : vector<8x512xf32> to vector<8x128xf32>
    %282 = math.tanh %281 : vector<8x128xf32>
    %283 = vector.extract_strided_slice %268 {offsets = [0, 384], sizes = [8, 128], strides = [1, 1]} : vector<8x512xf32> to vector<8x128xf32>
    %284 = arith.negf %283 : vector<8x128xf32>
    %285 = math.exp %284 : vector<8x128xf32>
    %cst_55 = arith.constant 1.000000e+00 : f32
    %286 = vector.broadcast %cst_55 : f32 to vector<8x128xf32>
    %287 = arith.addf %286, %285 : vector<8x128xf32>
    %288 = arith.divf %286, %287 : vector<8x128xf32>
    %289 = arith.mulf %280, %260 : vector<8x128xf32>
    %290 = arith.mulf %274, %282 : vector<8x128xf32>
    %291 = arith.addf %289, %290 : vector<8x128xf32>
    %292 = math.tanh %291 : vector<8x128xf32>
    %293 = arith.mulf %288, %292 : vector<8x128xf32>
    %c6_i32 = arith.constant 6 : i32
    %294 = arith.addi %11, %c6_i32 : i32
    %295 = vector.broadcast %294 : i32 to vector<8x1xi32>
    %296 = arith.cmpi sgt, %10, %295 : vector<8x1xi32>
    %297 = vector.shape_cast %296 : vector<8x1xi1> to vector<8x1xi1>
    %298 = vector.broadcast %297 : vector<8x1xi1> to vector<8x128xi1>
    %299 = arith.select %298, %293, %257 : vector<8x128xi1>, vector<8x128xf32>
    %300 = vector.shape_cast %296 : vector<8x1xi1> to vector<8x1xi1>
    %301 = vector.broadcast %300 : vector<8x1xi1> to vector<8x128xi1>
    %302 = arith.select %301, %291, %260 : vector<8x128xi1>, vector<8x128xf32>
    %cst_56 = arith.constant 0.000000e+00 : f32
    %303 = vector.shape_cast %296 : vector<8x1xi1> to vector<8x1xi1>
    %304 = vector.broadcast %303 : vector<8x1xi1> to vector<8x128xi1>
    %305 = vector.broadcast %cst_56 : f32 to vector<8x128xf32>
    %306 = arith.select %304, %293, %305 : vector<8x128xi1>, vector<8x128xf32>
    %c48 = arith.constant 48 : index
    %c0_57 = arith.constant 0 : index
    %307 = vector.load %arg6[%c48, %c0_57] : memref<64x128xf32, #tpu.memory_space<vmem>>, vector<8x128xf32>
    tpu.vector_store %arg6[%c48, %c0_57], %306 {strides = array<i32>} : memref<64x128xf32, #tpu.memory_space<vmem>>, vector<8x128xf32>,
    %308 = vector.extract_strided_slice %8 {offsets = [56, 0], sizes = [8, 512], strides = [1, 1]} : vector<64x512xf32> to vector<8x512xf32>
    %cst_58 = arith.constant dense<0.000000e+00> : vector<8x512xf32>
    %309 = tpu.matmul %299, %9, %cst_58 {dimension_numbers = #tpu.dot_dimension_numbers<[1], [0], [0], [1], [0, 0, 1, 1], [], []>} : vector<8x128xf32>, vector<128x512xf32>, vector<8x512xf32> -> vector<8x512xf32>
    %310 = arith.addf %308, %309 : vector<8x512xf32>
    %311 = vector.extract_strided_slice %310 {offsets = [0, 0], sizes = [8, 128], strides = [1, 1]} : vector<8x512xf32> to vector<8x128xf32>
    %312 = arith.negf %311 : vector<8x128xf32>
    %313 = math.exp %312 : vector<8x128xf32>
    %cst_59 = arith.constant 1.000000e+00 : f32
    %314 = vector.broadcast %cst_59 : f32 to vector<8x128xf32>
    %315 = arith.addf %314, %313 : vector<8x128xf32>
    %316 = arith.divf %314, %315 : vector<8x128xf32>
    %317 = vector.extract_strided_slice %310 {offsets = [0, 128], sizes = [8, 128], strides = [1, 1]} : vector<8x512xf32> to vector<8x128xf32>
    %318 = arith.negf %317 : vector<8x128xf32>
    %319 = math.exp %318 : vector<8x128xf32>
    %cst_60 = arith.constant 1.000000e+00 : f32
    %320 = vector.broadcast %cst_60 : f32 to vector<8x128xf32>
    %321 = arith.addf %320, %319 : vector<8x128xf32>
    %322 = arith.divf %320, %321 : vector<8x128xf32>
    %323 = vector.extract_strided_slice %310 {offsets = [0, 256], sizes = [8, 128], strides = [1, 1]} : vector<8x512xf32> to vector<8x128xf32>
    %324 = math.tanh %323 : vector<8x128xf32>
    %325 = vector.extract_strided_slice %310 {offsets = [0, 384], sizes = [8, 128], strides = [1, 1]} : vector<8x512xf32> to vector<8x128xf32>
    %326 = arith.negf %325 : vector<8x128xf32>
    %327 = math.exp %326 : vector<8x128xf32>
    %cst_61 = arith.constant 1.000000e+00 : f32
    %328 = vector.broadcast %cst_61 : f32 to vector<8x128xf32>
    %329 = arith.addf %328, %327 : vector<8x128xf32>
    %330 = arith.divf %328, %329 : vector<8x128xf32>
    %331 = arith.mulf %322, %302 : vector<8x128xf32>
    %332 = arith.mulf %316, %324 : vector<8x128xf32>
    %333 = arith.addf %331, %332 : vector<8x128xf32>
    %334 = math.tanh %333 : vector<8x128xf32>
    %335 = arith.mulf %330, %334 : vector<8x128xf32>
    %c7_i32 = arith.constant 7 : i32
    %336 = arith.addi %11, %c7_i32 : i32
    %337 = vector.broadcast %336 : i32 to vector<8x1xi32>
    %338 = arith.cmpi sgt, %10, %337 : vector<8x1xi32>
    %339 = vector.shape_cast %338 : vector<8x1xi1> to vector<8x1xi1>
    %340 = vector.broadcast %339 : vector<8x1xi1> to vector<8x128xi1>
    %341 = arith.select %340, %335, %299 : vector<8x128xi1>, vector<8x128xf32>
    %342 = vector.shape_cast %338 : vector<8x1xi1> to vector<8x1xi1>
    %343 = vector.broadcast %342 : vector<8x1xi1> to vector<8x128xi1>
    %344 = arith.select %343, %333, %302 : vector<8x128xi1>, vector<8x128xf32>
    %cst_62 = arith.constant 0.000000e+00 : f32
    %345 = vector.shape_cast %338 : vector<8x1xi1> to vector<8x1xi1>
    %346 = vector.broadcast %345 : vector<8x1xi1> to vector<8x128xi1>
    %347 = vector.broadcast %cst_62 : f32 to vector<8x128xf32>
    %348 = arith.select %346, %335, %347 : vector<8x128xi1>, vector<8x128xf32>
    %c56 = arith.constant 56 : index
    %c0_63 = arith.constant 0 : index
    %349 = vector.load %arg6[%c56, %c0_63] : memref<64x128xf32, #tpu.memory_space<vmem>>, vector<8x128xf32>
    tpu.vector_store %arg6[%c56, %c0_63], %348 {strides = array<i32>} : memref<64x128xf32, #tpu.memory_space<vmem>>, vector<8x128xf32>,
    %c0_64 = arith.constant 0 : index
    %c0_65 = arith.constant 0 : index
    %350 = vector.load %arg7[%c0_64, %c0_65] : memref<8x128xf32, #tpu.memory_space<vmem>>, vector<8x128xf32>
    tpu.vector_store %arg7[%c0_64, %c0_65], %341 {strides = array<i32>} : memref<8x128xf32, #tpu.memory_space<vmem>>, vector<8x128xf32>,
    %c0_66 = arith.constant 0 : index
    %c0_67 = arith.constant 0 : index
    %351 = vector.load %arg8[%c0_66, %c0_67] : memref<8x128xf32, #tpu.memory_space<vmem>>, vector<8x128xf32>
    tpu.vector_store %arg8[%c0_66, %c0_67], %344 {strides = array<i32>} : memref<8x128xf32, #tpu.memory_space<vmem>>, vector<8x128xf32>,
    return
  }
  func.func @transform_0(%arg0: i32) -> (i32, i32) {
    %c0_i32 = arith.constant 0 : i32
    %c0_i32_0 = arith.constant 0 : i32
    return %arg0, %c0_i32 : i32, i32
  }
  func.func @transform_1(%arg0: i32) -> (i32, i32) {
    %c0_i32 = arith.constant 0 : i32
    %c0_i32_0 = arith.constant 0 : i32
    %c0_i32_1 = arith.constant 0 : i32
    return %c0_i32, %c0_i32_0 : i32, i32
  }
  func.func @transform_2(%arg0: i32) -> (i32, i32) {
    %c0_i32 = arith.constant 0 : i32
    %c0_i32_0 = arith.constant 0 : i32
    %c0_i32_1 = arith.constant 0 : i32
    return %c0_i32, %c0_i32_0 : i32, i32
  }
  func.func @transform_3(%arg0: i32) -> (i32, i32) {
    %c0_i32 = arith.constant 0 : i32
    %c0_i32_0 = arith.constant 0 : i32
    %c0_i32_1 = arith.constant 0 : i32
    return %c0_i32, %c0_i32_0 : i32, i32
  }
  func.func @transform_4(%arg0: i32) -> (i32, i32) {
    %c0_i32 = arith.constant 0 : i32
    %c0_i32_0 = arith.constant 0 : i32
    %c0_i32_1 = arith.constant 0 : i32
    return %c0_i32, %c0_i32_0 : i32, i32
  }
  func.func @transform_5(%arg0: i32) -> (i32, i32) {
    %c0_i32 = arith.constant 0 : i32
    %c0_i32_0 = arith.constant 0 : i32
    return %arg0, %c0_i32 : i32, i32
  }
}

</mosaic_0001>

<bundles_post_ra>
// kernel: tpu_custom_call.1
= control target key start
LH: loop header
LB: loop body
LE: loop exit
PB: predicated region body
PF: predicated region fallthrough
CT: control target
= control target key end

     0   :  { %10 = vsyncpa [#allocation5], 0  ;;  %s3328_s0 = inlined_call_operand.vmem [shape: f32[64,32], index: 0, kind: input, shape index: {}]   ;;  %s3329_s1 = inlined_call_operand.hbm [shape: f32[32,512], index: 1, kind: input, shape index: {}]   ;;  %s3330_s2 = inlined_call_operand.hbm [shape: f32[128,512], index: 2, kind: input, shape index: {}]   ;;  %s3331_s3 = inlined_call_operand.vmem [shape: f32[1,512], index: 3, kind: input, shape index: {}]   ;;  %s3332_s4 = inlined_call_operand.vmem [shape: s32[8,1], index: 4, kind: input, shape index: {}]   ;;  %s3333_s5 = inlined_call_operand.hbm [shape: f32[64,128], index: 5, kind: output, shape index: {}]  }
   0x1   :  { %11 = vsyncpa [#allocation8], 0 }
   0x2   :  { %12 = vsyncpa [#allocation6], 0  ;;  %s2740_s18 = smov [#allocation4]   ;;  %s2668_s22 = scalar_lea.hbm %s3329_s1, 2048 }
   0x3   :  { %s20_s19 = sshll.u32 %s2740_s18, 4  ;;  %p2669_p0 = scmp.ne.s32.totalorder %s3329_s1, %s2668_s22  ;;  %s21_s19 = int_to_ptr.vmem [resolvable:$true] %s20_s19 }
   0x4   :  { %p2672_p1 = scmp.lt.u32.totalorder %s2668_s22, %s3329_s1 }
   0x6   :  { %p2674_p2 = pnand %p2672_p1, %p2669_p0 }
   0x8   :  { %2677 = shalt.err (!%p2674_p2)
}
   0x9   :  { %s2678_s27 = scalar_lea.vmem %s21_s19, 2048  ;;  %p2683_p4 = scmp.lt.s32.totalorder %s21_s19, %s21_s19 }
   0xa   :  { %p2679_p3 = scmp.ne.s32.totalorder %s21_s19, %s2678_s27  ;;  %p2684_p5 = scmp.lt.s32.totalorder %s2678_s27, %s2678_s27 }
   0xc   :  { %p2685_p6 = por %p2684_p5, %p2683_p4 }
   0xe   :  { %p2686_p7 = pnand %p2685_p6, %p2679_p3 }
  0x10   :  { %2689 = shalt.err (!%p2686_p7)
}
  0x11   :  { %s2741_s28 = smov 512   ;;  %s2742_s29 = smov 32  }
  0x12   :  { %26 = dma.hbm_to_vmem [thread:$0]  %s3329_s1, 2048, %s21_s19, [#allocation5], %s2741_s28, %s2741_s28, %s2742_s29  }
  0x13   :  { %s2743_s7 = smov [#allocation7]   ;;  %s2690_s11 = scalar_lea.hbm %s3330_s2, 8192 }
  0x14   :  { %s32_s8 = sshll.u32 %s2743_s7, 4  ;;  %p2691_p8 = scmp.ne.s32.totalorder %s3330_s2, %s2690_s11  ;;  %s33_s8 = int_to_ptr.vmem [resolvable:$true] %s32_s8 }
  0x15   :  { %p2694_p9 = scmp.lt.u32.totalorder %s2690_s11, %s3330_s2 }
  0x17   :  { %p2696_p10 = pnand %p2694_p9, %p2691_p8 }
  0x19   :  { %2699 = shalt.err (!%p2696_p10)
}
  0x1a   :  { %s2700_s16 = scalar_lea.vmem %s33_s8, 8192  ;;  %p2705_p12 = scmp.lt.s32.totalorder %s33_s8, %s33_s8 }
  0x1b   :  { %p2701_p11 = scmp.ne.s32.totalorder %s33_s8, %s2700_s16  ;;  %p2706_p13 = scmp.lt.s32.totalorder %s2700_s16, %s2700_s16 }
  0x1d   :  { %p2707_p0 = por %p2706_p13, %p2705_p12 }
  0x1f   :  { %p2708_p1 = pnand %p2707_p0, %p2701_p11 }
  0x21   :  { %2711 = shalt.err (!%p2708_p1)
}
  0x22   :  { %38 = dma.hbm_to_vmem [thread:$0]  %s3330_s2, 8192, %s33_s8, [#allocation8], %s2741_s28, %s2741_s28, %s2742_s29  }
  0x23   :  { %2734 = dma.done.wait [#allocation5], 2048  }
  0x24   :  { %2735 = vsyncadd [#allocation5], 4294965248 }
  0x25   :  { %2736 = dma.done.wait [#allocation8], 8192  }
  0x26   :  { %2737 = vsyncadd [#allocation8], 4294959104  ;;  %v2744_v0 = vmov 0.0   ;;  %v2745_v1 = vmov 0   ;;  %v64_v2 = vld [vmem:[#allocation4 + $0x8] sm:$0xff]  ;;  %v66_v4 = vld [vmem:[#allocation4 + $0x18] sm:$0xff] }
  0x27   :  { %190 = vmatprep.mubr.f32.mxu0 %v2744_v0  ;;  %303 = vmatprep.mubr.f32.mxu1 %v2744_v0  ;;  %v68_v3 = vld [vmem:[#allocation4 + $0x28] sm:$0xff]  ;;  %v70_v6 = vld [vmem:[#allocation4 + $0x38] sm:$0xff]  ;;  %v63_v7 = vld [vmem:[#allocation4] sm:$0xff]  ;;  %vm101_vm0 = vcmask 261120  }
  0x28   :  { %2538 = vset.pattern.permute.xlu0 %v2745_v1  ;;  %2539 = vset.pattern.permute.xlu1 %v2745_v1  ;;  %v1937_v5 = vpack.c.bf16 %v68_v3, %v64_v2  ;;  %v67_v8 = vld [vmem:[#allocation4 + $0x20] sm:$0xff]  ;;  %v1945_v9 = vpack.c.bf16 %v70_v6, %v66_v4  ;;  %v65_v11 = vld [vmem:[#allocation4 + $0x10] sm:$0xff]  ;;  %v72_v13 = vld [vmem:[#allocation4 + $0x48] sm:$0xff] }
  0x29   :  { %v1939_v10 = vpack.c.bf16 %v67_v8, %v63_v7  ;;  %v69_v12 = vld [vmem:[#allocation4 + $0x30] sm:$0xff]  ;;  %v76_v15 = vld [vmem:[#allocation4 + $0x68] sm:$0xff]  ;;  %v74_v16 = vld [vmem:[#allocation4 + $0x58] sm:$0xff] }
  0x2a   :  { %1938 = vmatprep.subr.bf16.mxu0 %v1937_v5  ;;  %v1947_v14 = vpack.c.bf16 %v69_v12, %v65_v11  ;;  %v78_v17 = vld [vmem:[#allocation4 + $0x78] sm:$0xff]  ;;  %1946 = vmatprep.subr.bf16.mxu1 %v1945_v9  ;;  %v1941_v18 = vpack.c.bf16 %v76_v15, %v72_v13  ;;  %v71_v20 = vld [vmem:[#allocation4 + $0x40] sm:$0xff]  ;;  %v73_v22 = vld [vmem:[#allocation4 + $0x50] sm:$0xff] }
  0x2b   :  { %1940 = vmatpush1.bf16.msra.mxu0 %v1939_v10  ;;  %v1949_v19 = vpack.c.bf16 %v78_v17, %v74_v16  ;;  %v75_v21 = vld [vmem:[#allocation4 + $0x60] sm:$0xff]  ;;  %v77_v24 = vld [vmem:[#allocation4 + $0x70] sm:$0xff]  ;;  %v353_v25 = vld [vmem:[#allocation7 + $0x8] sm:$0xff] }
  0x2c   :  { %1948 = vmatpush1.bf16.msra.mxu1 %v1947_v14  ;;  %v1943_v23 = vpack.c.bf16 %v75_v21, %v71_v20  ;;  %1942 = vmatprep.subr.bf16.mxu0 %v1941_v18  ;;  %v1951_v26 = vpack.c.bf16 %v77_v24, %v73_v22  ;;  %v357_v27 = vld [vmem:[#allocation7 + $0x28] sm:$0xff]  ;;  %v355_v28 = vld [vmem:[#allocation7 + $0x18] sm:$0xff]  ;;  %v352_v32 = vld [vmem:[#allocation7] sm:$0xff] }
  0x2d   :  { %1950 = vmatprep.subr.bf16.mxu1 %v1949_v19  ;;  %v359_v29 = vld [vmem:[#allocation7 + $0x38] sm:$0xff]  ;;  %v2807_v30 = vpack.c.bf16 %v357_v27, %v353_v25  ;;  %v356_v33 = vld [vmem:[#allocation7 + $0x20] sm:$0xff]  ;;  %v354_v34 = vld [vmem:[#allocation7 + $0x10] sm:$0xff] }
  0x2e   :  { %v2809_v31 = vpack.c.bf16 %v359_v29, %v355_v28  ;;  %v55_v35 = vld [vmem:[%s3328_s0] sm:$0xff]  ;;  %v2814_v36 = vpack.c.bf16 %v356_v33, %v352_v32  ;;  %v358_v37 = vld [vmem:[#allocation7 + $0x30] sm:$0xff]  ;;  %v361_v38 = vld [vmem:[#allocation7 + $0x48] sm:$0xff] }
  0x2f   :  { %1944 = vmatpush1.bf16.msra.mxu0 %v1943_v23  ;;  %v2817_v39 = vpack.c.bf16 %v358_v37, %v354_v34  ;;  %v365_v40 = vld [vmem:[#allocation7 + $0x68] sm:$0xff]  ;;  %v363_v41 = vld [vmem:[#allocation7 + $0x58] sm:$0xff]  ;;  %v360_v44 = vld [vmem:[#allocation7 + $0x40] sm:$0xff] }
  0x30   :  { %1952 = vmatpush1.bf16.msra.mxu1 %v1951_v26  ;;  %1954 = vmatprep.subr.bf16.mxu0 %v2807_v30  ;;  %v367_v42 = vld [vmem:[#allocation7 + $0x78] sm:$0xff]  ;;  %v2820_v43 = vpack.c.bf16 %v365_v40, %v361_v38  ;;  %v364_v45 = vld [vmem:[#allocation7 + $0x60] sm:$0xff]  ;;  %v362_v46 = vld [vmem:[#allocation7 + $0x50] sm:$0xff] }
  0x31   :  { %1986 = vmatprep.subr.bf16.mxu1 %v2809_v31  ;;  %v56_v47 = vld [vmem:[%s3328_s0 + $0x8] sm:$0xff]  ;;  %v2826_v48 = vpack.c.bf16 %v367_v42, %v363_v41  ;;  %v366_v49 = vld [vmem:[#allocation7 + $0x70] sm:$0xff]  ;;  %v2830_v51 = vpack.c.bf16 %v364_v45, %v360_v44  ;;  %v371_v53 = vld [vmem:[#allocation7 + $0x98] sm:$0xff] }
  0x32   :  { %1895 = vmatmul.mubr.msk.f32.vlgmr.msra.gmra.mrb[0].mxu0 %vm101_vm0, %v55_v35  ;;  %v369_v50 = vld [vmem:[#allocation7 + $0x88] sm:$0xff]  ;;  %v375_v54 = vld [vmem:[#allocation7 + $0xb8] sm:$0xff]  ;;  %v2834_v55 = vpack.c.bf16 %v366_v49, %v362_v46  ;;  %v368_v56 = vld [vmem:[#allocation7 + $0x80] sm:$0xff] }
  0x33   :  { %1903 = vmatmul.mubr.msk.f32.vlgmr.msra.gmra.mrb[0].mxu1 %vm101_vm0, %v55_v35  ;;  %1956 = vmatpush1.bf16.msra.mxu0 %v2814_v36  ;;  %v373_v52 = vld [vmem:[#allocation7 + $0xa8] sm:$0xff]  ;;  %v372_v57 = vld [vmem:[#allocation7 + $0xa0] sm:$0xff]  ;;  %v370_v59 = vld [vmem:[#allocation7 + $0x90] sm:$0xff]  ;;  %v2842_v61 = vpack.c.bf16 %v375_v54, %v371_v53 }
  0x34   :  { %1988 = vmatpush1.bf16.msra.mxu1 %v2817_v39  ;;  %196 = vmatprep.mubr.f32.mxu0 %v2744_v0  ;;  %v2838_v58 = vpack.c.bf16 %v373_v52, %v369_v50  ;;  %v374_v60 = vld [vmem:[#allocation7 + $0xb0] sm:$0xff]  ;;  %v377_v62 = vld [vmem:[#allocation7 + $0xc8] sm:$0xff]  ;;  %v2849_v3 = vpack.c.bf16 %v372_v57, %v368_v56  ;;  %v379_v4 = vld [vmem:[#allocation7 + $0xd8] sm:$0xff] }
  0x35   :  { %309 = vmatprep.mubr.f32.mxu1 %v2744_v0  ;;  %1958 = vmatprep.subr.bf16.mxu0 %v2820_v43  ;;  %v381_v63 = vld [vmem:[#allocation7 + $0xe8] sm:$0xff]  ;;  %v57_v2 = vld [vmem:[%s3328_s0 + $0x10] sm:$0xff]  ;;  %v383_v5 = vld [vmem:[#allocation7 + $0xf8] sm:$0xff]  ;;  %v2853_v6 = vpack.c.bf16 %v374_v60, %v370_v59 }
  0x36   :  { %1896 = vmatmul.mubr.msk.f32.gmra.mrb[2].mxu0 %vm101_vm0, %v56_v47  ;;  %1990 = vmatprep.subr.bf16.mxu1 %v2826_v48  ;;  %v376_v7 = vld [vmem:[#allocation7 + $0xc0] sm:$0xff]  ;;  %v2857_v9 = vpack.c.bf16 %v381_v63, %v377_v62  ;;  %v378_v10 = vld [vmem:[#allocation7 + $0xd0] sm:$0xff]  ;;  %v2861_v12 = vpack.c.bf16 %v383_v5, %v379_v4  ;;  %v385_v13 = vld [vmem:[#allocation7 + $0x108] sm:$0xff] }
  0x37   :  { %1904 = vmatmul.mubr.msk.f32.gmra.mrb[2].mxu1 %vm101_vm0, %v56_v47  ;;  %1960 = vmatpush1.bf16.msra.mxu0 %v2830_v51  ;;  %v380_v8 = vld [vmem:[#allocation7 + $0xe0] sm:$0xff]  ;;  %v382_v11 = vld [vmem:[#allocation7 + $0xf0] sm:$0xff]  ;;  %v389_v14 = vld [vmem:[#allocation7 + $0x128] sm:$0xff] }
  0x38   :  { %1992 = vmatpush1.bf16.msra.mxu1 %v2834_v55  ;;  %202 = vmatprep.mubr.f32.mxu0 %v2744_v0  ;;  %v58_v15 = vld [vmem:[%s3328_s0 + $0x18] sm:$0xff]  ;;  %v2868_v16 = vpack.c.bf16 %v380_v8, %v376_v7  ;;  %v2872_v19 = vpack.c.bf16 %v382_v11, %v378_v10  ;;  %v384_v20 = vld [vmem:[#allocation7 + $0x100] sm:$0xff]  ;;  %v2876_v22 = vpack.c.bf16 %v389_v14, %v385_v13  ;;  %v386_v23 = vld [vmem:[#allocation7 + $0x110] sm:$0xff] }
  0x39   :  { %315 = vmatprep.mubr.f32.mxu1 %v2744_v0  ;;  %1962 = vmatprep.subr.bf16.mxu0 %v2838_v58  ;;  %v387_v17 = vld [vmem:[#allocation7 + $0x118] sm:$0xff]  ;;  %v388_v21 = vld [vmem:[#allocation7 + $0x120] sm:$0xff]  ;;  %v390_v24 = vld [vmem:[#allocation7 + $0x130] sm:$0xff] }
  0x3a   :  { %1897 = vmatmul.mubr.msk.f32.gmra.mrb[4].mxu0 %vm101_vm0, %v57_v2  ;;  %1994 = vmatprep.subr.bf16.mxu1 %v2842_v61  ;;  %v391_v18 = vld [vmem:[#allocation7 + $0x138] sm:$0xff]  ;;  %v393_v26 = vld [vmem:[#allocation7 + $0x148] sm:$0xff]  ;;  %v59_v28 = vld [vmem:[%s3328_s0 + $0x20] sm:$0xff]  ;;  %v2887_v29 = vpack.c.bf16 %v388_v21, %v384_v20  ;;  %v2891_v34 = vpack.c.bf16 %v390_v24, %v386_v23 }
  0x3b   :  { %1905 = vmatmul.mubr.msk.f32.gmra.mrb[4].mxu1 %vm101_vm0, %v57_v2  ;;  %1964 = vmatpush1.bf16.msra.mxu0 %v2849_v3  ;;  %v2880_v25 = vpack.c.bf16 %v391_v18, %v387_v17  ;;  %v397_v27 = vld [vmem:[#allocation7 + $0x168] sm:$0xff]  ;;  %v395_v32 = vld [vmem:[#allocation7 + $0x158] sm:$0xff]  ;;  %v392_v35 = vld [vmem:[#allocation7 + $0x140] sm:$0xff] }
  0x3c   :  { %1996 = vmatpush1.bf16.msra.mxu1 %v2853_v6  ;;  %208 = vmatprep.mubr.f32.mxu0 %v2744_v0  ;;  %v399_v33 = vld [vmem:[#allocation7 + $0x178] sm:$0xff]  ;;  %v396_v37 = vld [vmem:[#allocation7 + $0x160] sm:$0xff]  ;;  %v2895_v38 = vpack.c.bf16 %v397_v27, %v393_v26  ;;  %v394_v40 = vld [vmem:[#allocation7 + $0x150] sm:$0xff] }
  0x3d   :  { %321 = vmatprep.mubr.f32.mxu1 %v2744_v0  ;;  %1966 = vmatprep.subr.bf16.mxu0 %v2857_v9  ;;  %v398_v41 = vld [vmem:[#allocation7 + $0x170] sm:$0xff]  ;;  %v2899_v42 = vpack.c.bf16 %v399_v33, %v395_v32  ;;  %v401_v44 = vld [vmem:[#allocation7 + $0x188] sm:$0xff]  ;;  %v2906_v47 = vpack.c.bf16 %v396_v37, %v392_v35  ;;  %v403_v49 = vld [vmem:[#allocation7 + $0x198] sm:$0xff]  ;;  %v81_v32 = vlaneseq }
  0x3e   :  { %1898 = vmatmul.mubr.msk.f32.gmra.mrb[6].mxu0 %vm101_vm0, %v58_v15  ;;  %1998 = vmatprep.subr.bf16.mxu1 %v2861_v12  ;;  %v405_v45 = vld [vmem:[#allocation7 + $0x1a8] sm:$0xff]  ;;  %v407_v50 = vld [vmem:[#allocation7 + $0x1b8] sm:$0xff]  ;;  %v2910_v52 = vpack.c.bf16 %v398_v41, %v394_v40  ;;  %v400_v53 = vld [vmem:[#allocation7 + $0x180] sm:$0xff] }
  0x3f   :  { %1906 = vmatmul.mubr.msk.f32.gmra.mrb[6].mxu1 %vm101_vm0, %v58_v15  ;;  %1968 = vmatpush1.bf16.msra.mxu0 %v2868_v16  ;;  %v60_v46 = vld [vmem:[%s3328_s0 + $0x28] sm:$0xff]  ;;  %v404_v54 = vld [vmem:[#allocation7 + $0x1a0] sm:$0xff]  ;;  %v2914_v56 = vpack.c.bf16 %v405_v45, %v401_v44  ;;  %v402_v57 = vld [vmem:[#allocation7 + $0x190] sm:$0xff]  ;;  %v2918_v60 = vpack.c.bf16 %v407_v50, %v403_v49  ;;  %v82_v33 = vshrl.u32 %v81_v32, 7 }
  0x40   :  { %2000 = vmatpush1.bf16.msra.mxu1 %v2872_v19  ;;  %214 = vmatprep.mubr.f32.mxu0 %v2744_v0  ;;  %v406_v59 = vld [vmem:[#allocation7 + $0x1b0] sm:$0xff]  ;;  %v409_v62 = vld [vmem:[#allocation7 + $0x1c8] sm:$0xff]  ;;  %v2925_v4 = vpack.c.bf16 %v404_v54, %v400_v53  ;;  %v411_v5 = vld [vmem:[#allocation7 + $0x1d8] sm:$0xff] }
  0x41   :  { %327 = vmatprep.mubr.f32.mxu1 %v2744_v0  ;;  %1970 = vmatprep.subr.bf16.mxu0 %v2876_v22  ;;  %v413_v63 = vld [vmem:[#allocation7 + $0x1e8] sm:$0xff]  ;;  %v61_v2 = vld [vmem:[%s3328_s0 + $0x30] sm:$0xff]  ;;  %v415_v7 = vld [vmem:[#allocation7 + $0x1f8] sm:$0xff]  ;;  %v2929_v8 = vpack.c.bf16 %v406_v59, %v402_v57  ;;  %v83_v35 = vsub.s32 0, %v82_v33  ;;  %v87_v40 = vsub.s32 1, %v82_v33 }
  0x42   :  { %1899 = vmatmul.mubr.msk.f32.gmra.mrb[8].mxu0 %vm101_vm0, %v59_v28  ;;  %2002 = vmatprep.subr.bf16.mxu1 %v2880_v25  ;;  %v408_v10 = vld [vmem:[#allocation7 + $0x1c0] sm:$0xff]  ;;  %v2938_v14 = vpack.c.bf16 %v413_v63, %v409_v62  ;;  %v410_v15 = vld [vmem:[#allocation7 + $0x1d0] sm:$0xff]  ;;  %v2942_v18 = vpack.c.bf16 %v415_v7, %v411_v5  ;;  %v62_v20 = vld [vmem:[%s3328_s0 + $0x38] sm:$0xff] }
  0x43   :  { %1907 = vmatmul.mubr.msk.f32.gmra.mrb[8].mxu1 %vm101_vm0, %v59_v28  ;;  %1972 = vmatpush1.bf16.msra.mxu0 %v2887_v29  ;;  %v412_v11 = vld [vmem:[#allocation7 + $0x1e0] sm:$0xff]  ;;  %v414_v17 = vld [vmem:[#allocation7 + $0x1f0] sm:$0xff] }
  0x44   :  { %2004 = vmatpush1.bf16.msra.mxu1 %v2891_v34  ;;  %220 = vmatprep.mubr.f32.mxu0 %v2744_v0  ;;  %v2934_v13 = vld [vmem:[%s3332_s4] sm:$0xff]  ;;  %v2949_v21 = vpack.c.bf16 %v412_v11, %v408_v10  ;;  %v2954_v23 = vpack.c.bf16 %v414_v17, %v410_v15 }
  0x45   :  { %333 = vmatprep.mubr.f32.mxu1 %v2744_v0  ;;  %1974 = vmatprep.subr.bf16.mxu0 %v2895_v38  ;;  %vm591_vm1 = vcmp.gt.s32.totalorder %v2934_v13, 0  ;;  %vm773_vm2 = vcmp.gt.s32.totalorder %v2934_v13, 1  ;;  %vm1319_vm3 = vcmp.gt.s32.totalorder %v2934_v13, 4  ;;  %vm1683_vm4 = vcmp.gt.s32.totalorder %v2934_v13, 6  ;;  %v79_v37 = vld [vmem:[%s3331_s3] sm:$0xf] }
  0x46   :  { %1900 = vmatmul.mubr.msk.f32.gmra.mrb[10].mxu0 %vm101_vm0, %v60_v46  ;;  %2006 = vmatprep.subr.bf16.mxu1 %v2899_v42  ;;  %v592_v24 = vsel %vm591_vm1, 1, %v2745_v1  ;;  %v774_v26 = vsel %vm773_vm2, 1, %v2745_v1  ;;  %v1320_v27 = vsel %vm1319_vm3, 1, %v2745_v1  ;;  %v1684_v28 = vsel %vm1683_vm4, 1, %v2745_v1  ;;  %s2746_s3 = smov [#allocation9]  }
  0x47   :  { %1908 = vmatmul.mubr.msk.f32.gmra.mrb[10].mxu1 %vm101_vm0, %v60_v46  ;;  %1976 = vmatpush1.bf16.msra.mxu0 %v2906_v47  ;;  %v3013_v41 = vrot.slane %v79_v37, %v83_v35  ;;  %v3015_v44 = vrot.slane %v79_v37, %v87_v40  ;;  %v95_v46 = vsub.s32 3, %v82_v33  ;;  %vm955_vm6 = vcmp.gt.s32.totalorder %v2934_v13, 2  ;;  %s1882_s10 = sshll.u32 %s2746_s3, 4  ;;  %s1883_s10 = int_to_ptr.vmem [resolvable:$true] %s1882_s10 }
  0x48   :  { %2008 = vmatpush1.bf16.msra.mxu1 %v2910_v52  ;;  %226 = vmatprep.mubr.f32.mxu0 %v2744_v0  ;;  %vm1137_vm7 = vcmp.gt.s32.totalorder %v2934_v13, 3  ;;  %vm1501_vm8 = vcmp.gt.s32.totalorder %v2934_v13, 5  ;;  %vm1865_vm9 = vcmp.gt.s32.totalorder %v2934_v13, 7  ;;  %s2712_s11 = scalar_lea.vmem %s1883_s10, 1024  ;;  %p2717_p3 = scmp.lt.s32.totalorder %s1883_s10, %s1883_s10 }
  0x49   :  { %339 = vmatprep.mubr.f32.mxu1 %v2744_v0  ;;  %1978 = vmatprep.subr.bf16.mxu0 %v2914_v56  ;;  %v3019_v63 = vrot.slane %v79_v37, %v95_v46  ;;  %p2713_p2 = scmp.ne.s32.totalorder %s1883_s10, %s2712_s11  ;;  %p2718_p4 = scmp.lt.s32.totalorder %s2712_s11, %s2712_s11 }
  0x4a   :  { %1901 = vmatmul.mubr.msk.f32.gmra.mrb[12].mxu0 %vm101_vm0, %v61_v2  ;;  %2010 = vmatprep.subr.bf16.mxu1 %v2918_v60 }
  0x4b   :  { %1909 = vmatmul.mubr.msk.f32.gmra.mrb[12].mxu1 %vm101_vm0, %v61_v2  ;;  %1980 = vmatpush1.bf16.msra.mxu0 %v2925_v4  ;;  %v91_v2 = vsub.s32 2, %v82_v33  ;;  %p2719_p5 = por %p2718_p4, %p2717_p3 }
  0x4c   :  { %2012 = vmatpush1.bf16.msra.mxu1 %v2929_v8  ;;  %232 = vmatprep.mubr.f32.mxu0 %v2744_v0 }
  0x4d   :  { %345 = vmatprep.mubr.f32.mxu1 %v2744_v0  ;;  %1982 = vmatprep.subr.bf16.mxu0 %v2938_v14  ;;  %v3022_v7 = vrot.slane %v79_v37, %v91_v2  ;;  %v1866_v2 = vsel %vm1865_vm9, 1, %v2745_v1  ;;  %p2720_p6 = pnand %p2719_p5, %p2713_p2 }
  0x4e   :  { %1902 = vmatmul.mubr.msk.f32.gmra.mrb[14].mxu0 %vm101_vm0, %v62_v20  ;;  %2014 = vmatprep.subr.bf16.mxu1 %v2942_v18 }
  0x4f   :  { %1910 = vmatmul.mubr.msk.f32.gmra.mrb[14].mxu1 %vm101_vm0, %v62_v20  ;;  %1984 = vmatpush1.bf16.msra.mxu0 %v2949_v21 }
  0x50   :  { %2016 = vmatpush1.bf16.msra.mxu1 %v2954_v23  ;;  %484 = vmatprep.mubr.f32.mxu0 %v2744_v0 }
  0x51   :  { %555 = vmatprep.mubr.f32.mxu1 %v2744_v0  ;;  %594 = vperm.xlu0 %2538, %v592_v24  }
  0x52   :  { %485 = vmatmul.mubr.f32.vlgmr.msra.gmra.mrb[0].mxu0 %v2744_v0  ;;  %2018 = vmatprep.subr.bf16.mxu0 %v2807_v30 }
  0x53   :  { %556 = vmatmul.mubr.f32.vlgmr.msra.gmra.mrb[0].mxu1 %v2744_v0  ;;  %2050 = vmatprep.subr.bf16.mxu1 %v2809_v31 }
  0x54   :  { %2020 = vmatpush1.bf16.msra.mxu0 %v2814_v36  ;;  %2052 = vmatpush1.bf16.msra.mxu1 %v2817_v39 }
  0x55   :  { %776 = vperm.xlu0 %2538, %v774_v26   ;;  %2022 = vmatprep.subr.bf16.mxu0 %v2820_v43 }
  0x56   :  { %2054 = vmatprep.subr.bf16.mxu1 %v2826_v48  ;;  %665 = vmatprep.mubr.f32.mxu0 %v2744_v0 }
  0x57   :  { %736 = vmatprep.mubr.f32.mxu1 %v2744_v0 }
  0x58   :  { %2024 = vmatpush1.bf16.msra.mxu0 %v2830_v51  ;;  %2056 = vmatpush1.bf16.msra.mxu1 %v2834_v55 }
  0x59   :  { %1322 = vperm.xlu0 %2538, %v1320_v27   ;;  %2026 = vmatprep.subr.bf16.mxu0 %v2838_v58 }
  0x5a   :  { %2058 = vmatprep.subr.bf16.mxu1 %v2842_v61 }
  0x5c   :  { %2028 = vmatpush1.bf16.msra.mxu0 %v2849_v3  ;;  %2060 = vmatpush1.bf16.msra.mxu1 %v2853_v6 }
  0x5d   :  { %1686 = vperm.xlu0 %2538, %v1684_v28   ;;  %2030 = vmatprep.subr.bf16.mxu0 %v2857_v9 }
  0x5e   :  { %2062 = vmatprep.subr.bf16.mxu1 %v2861_v12 }
  0x60   :  { %2032 = vmatpush1.bf16.msra.mxu0 %v2868_v16  ;;  %2064 = vmatpush1.bf16.msra.mxu1 %v2872_v19 }
  0x61   :  { %2034 = vmatprep.subr.bf16.mxu0 %v2876_v22  ;;  %2066 = vmatprep.subr.bf16.mxu1 %v2880_v25 }
  0x64   :  { %2036 = vmatpush1.bf16.msra.mxu0 %v2887_v29  ;;  %2068 = vmatpush1.bf16.msra.mxu1 %v2891_v34 }
  0x65   :  { %2038 = vmatprep.subr.bf16.mxu0 %v2895_v38  ;;  %2070 = vmatprep.subr.bf16.mxu1 %v2899_v42 }
  0x68   :  { %2040 = vmatpush1.bf16.msra.mxu0 %v2906_v47  ;;  %2072 = vmatpush1.bf16.msra.mxu1 %v2910_v52 }
  0x69   :  { %2042 = vmatprep.subr.bf16.mxu0 %v2914_v56  ;;  %2074 = vmatprep.subr.bf16.mxu1 %v2918_v60 }
  0x6c   :  { %2044 = vmatpush1.bf16.msra.mxu0 %v2925_v4  ;;  %2076 = vmatpush1.bf16.msra.mxu1 %v2929_v8 }
  0x6d   :  { %2046 = vmatprep.subr.bf16.mxu0 %v2938_v14  ;;  %2078 = vmatprep.subr.bf16.mxu1 %v2942_v18 }
  0x70   :  { %2048 = vmatpush1.bf16.msra.mxu0 %v2949_v21  ;;  %2080 = vmatpush1.bf16.msra.mxu1 %v2954_v23 }
  0x71   :  { %2082 = vmatprep.subr.bf16.mxu0 %v2807_v30  ;;  %2114 = vmatprep.subr.bf16.mxu1 %v2809_v31 }
  0xd0   :  { %v595_v32 = vpop.permute.xlu0 %594 }
  0xd1   :  { %vm596_vm5 = vcmp.eq.s32.totalorder %v595_v32, 1 }
 0x125   :  { %v486_v45 = vpop.f32.mrb[0].mxu0 }
 0x126   :  { %v2465_v49 = vadd.f32 %v486_v45, %v3013_v41  ;;  %v557_v50 = vpop.f32.mrb[0].mxu1  ;;  %v488_v53 = vpop.f32.mrb[1].mxu0 }
 0x127   :  { %v2466_v54 = vadd.f32 %v488_v53, %v3015_v44  ;;  %v559_v57 = vpop.f32.mrb[1].mxu1  ;;  %v2481_v11 = vadd.f32 %v557_v50, %v3022_v7 }
 0x128   :  { %v1911_v59 = vmul.f32 -1.442695, %v2465_v49  ;;  %v2482_v5 = vadd.f32 %v559_v57, %v3019_v63  ;;  %v956_v57 = vsel %vm955_vm6, 1, %v2745_v1 }
 0x129   :  { %v1912_v62 = vmul.f32 -1.442695, %v2466_v54  ;;  %958 = vperm.xlu1 %2539, %v956_v57  }
 0x12a   :  { %2540 = vpow2.f32 %v1911_v59  ;;  %v1913_v10 = vmul.f32 -1.442695, %v2482_v5  ;;  %v1138_v59 = vsel %vm1137_vm7, 1, %v2745_v1 }
 0x12b   :  { %2542 = vpow2.f32 %v1912_v62  ;;  %v1502_v62 = vsel %vm1501_vm8, 1, %v2745_v1 }
 0x12c   :  { %2544 = vpow2.f32 %v1913_v10 }
 0x12d   :  { %2546 = vtanh.f32 %v2481_v11  ;;  %1140 = vperm.xlu1 %2539, %v1138_v59   ;;  %v777_v59 = vpop.permute.xlu0 %776 }
 0x12e   :  { %vm778_vm10 = vcmp.eq.s32.totalorder %v777_v59, 1 }
 0x131   :  { %1504 = vperm.xlu1 %2539, %v1502_v62  }
 0x134   :  { %v2541_v15 = vpop.eup %2540 }
 0x135   :  { %v2543_v17 = vpop.eup %2542  ;;  %v569_v20 = vadd.f32 1.0, %v2541_v15  ;;  %1868 = vperm.xlu1 %2539, %v1866_v2  }
 0x136   :  { %v575_v24 = vadd.f32 1.0, %v2543_v17  ;;  %v2545_v26 = vpop.eup %2544 }
 0x137   :  { %2548 = vrcp.f32 %v569_v20  ;;  %v2547_v27 = vpop.eup %2546  ;;  %v582_v35 = vadd.f32 1.0, %v2545_v26 }
 0x138   :  { %2550 = vrcp.f32 %v575_v24 }
 0x139   :  { %2552 = vrcp.f32 %v582_v35 }
 0x141   :  { %v2549_v28 = vpop.eup %2548 }
 0x142   :  { %v2551_v33 = vpop.eup %2550  ;;  %v586_v40 = vmul.f32 %v2549_v28, %v2547_v27 }
 0x143   :  { %v585_v37 = vmul.f32 0.0, %v2551_v33  ;;  %v2553_v49 = vpop.eup %2552 }
 0x145   :  { %v587_v45 = vadd.f32 %v586_v40, %v585_v37 }
 0x147   :  { %2554 = vtanh.f32 %v587_v45  ;;  %v3025_v46 = vsel %vm596_vm5, %v587_v45, 0.0 }
 0x151   :  { %v2555_v50 = vpop.eup %2554 }
 0x152   :  { %v589_v53 = vmul.f32 %v2555_v50, %v2553_v49 }
 0x154   :  { %v3027_v54 = vsel %vm596_vm5, %v589_v53, 0.0  ;;  %1935 = vmatmul.mubr.msk.f32.vlgmr.msra.gmra.mrb[2].mxu0 %vm596_vm5, %v589_v53  ;;  %1936 = vmatmul.mubr.msk.f32.vlgmr.msra.gmra.mrb[2].mxu1 %vm596_vm5, %v589_v53 }
 0x155   :  { %600 = vst [vmem:[#allocation9] sm:$0xff] %v3027_v54  ;;  %2084 = vmatpush1.bf16.msra.mxu0 %v2814_v36  ;;  %2116 = vmatpush1.bf16.msra.mxu1 %v2817_v39 }
 0x156   :  { %2086 = vmatprep.subr.bf16.mxu0 %v2820_v43  ;;  %2118 = vmatprep.subr.bf16.mxu1 %v2826_v48 }
 0x157   :  { %847 = vmatprep.mubr.f32.mxu0 %v2744_v0  ;;  %918 = vmatprep.mubr.f32.mxu1 %v2744_v0 }
 0x159   :  { %2088 = vmatpush1.bf16.msra.mxu0 %v2830_v51  ;;  %2120 = vmatpush1.bf16.msra.mxu1 %v2834_v55 }
 0x15a   :  { %2090 = vmatprep.subr.bf16.mxu0 %v2838_v58  ;;  %2122 = vmatprep.subr.bf16.mxu1 %v2842_v61 }
 0x15d   :  { %2092 = vmatpush1.bf16.msra.mxu0 %v2849_v3  ;;  %2124 = vmatpush1.bf16.msra.mxu1 %v2853_v6 }
 0x15e   :  { %2094 = vmatprep.subr.bf16.mxu0 %v2857_v9  ;;  %2126 = vmatprep.subr.bf16.mxu1 %v2861_v12 }
 0x161   :  { %2096 = vmatpush1.bf16.msra.mxu0 %v2868_v16  ;;  %2128 = vmatpush1.bf16.msra.mxu1 %v2872_v19 }
 0x162   :  { %2098 = vmatprep.subr.bf16.mxu0 %v2876_v22  ;;  %2130 = vmatprep.subr.bf16.mxu1 %v2880_v25 }
 0x165   :  { %2100 = vmatpush1.bf16.msra.mxu0 %v2887_v29  ;;  %2132 = vmatpush1.bf16.msra.mxu1 %v2891_v34 }
 0x166   :  { %2102 = vmatprep.subr.bf16.mxu0 %v2895_v38  ;;  %2134 = vmatprep.subr.bf16.mxu1 %v2899_v42 }
 0x169   :  { %2104 = vmatpush1.bf16.msra.mxu0 %v2906_v47  ;;  %2136 = vmatpush1.bf16.msra.mxu1 %v2910_v52 }
 0x16a   :  { %2106 = vmatprep.subr.bf16.mxu0 %v2914_v56  ;;  %2138 = vmatprep.subr.bf16.mxu1 %v2918_v60 }
 0x16d   :  { %2108 = vmatpush1.bf16.msra.mxu0 %v2925_v4  ;;  %2140 = vmatpush1.bf16.msra.mxu1 %v2929_v8 }
 0x16e   :  { %2110 = vmatprep.subr.bf16.mxu0 %v2938_v14  ;;  %2142 = vmatprep.subr.bf16.mxu1 %v2942_v18 }
 0x171   :  { %2112 = vmatpush1.bf16.msra.mxu0 %v2949_v21  ;;  %2144 = vmatpush1.bf16.msra.mxu1 %v2954_v23 }
 0x172   :  { %2146 = vmatprep.subr.bf16.mxu0 %v2807_v30  ;;  %2178 = vmatprep.subr.bf16.mxu1 %v2809_v31 }
 0x227   :  { %v667_v5 = vpop.f32.mrb[2].mxu0  ;;  %v738_v10 = vpop.f32.mrb[2].mxu1 }
 0x228   :  { %v2467_v11 = vadd.f32 %v667_v5, %v3013_v41  ;;  %v669_v15 = vpop.f32.mrb[3].mxu0  ;;  %v740_v17 = vpop.f32.mrb[3].mxu1  ;;  %v2483_v13 = vadd.f32 %v738_v10, %v3022_v7 }
 0x229   :  { %v2468_v20 = vadd.f32 %v669_v15, %v3015_v44  ;;  %v2484_v27 = vadd.f32 %v740_v17, %v3019_v63 }
 0x22a   :  { %v1914_v24 = vmul.f32 -1.442695, %v2467_v11 }
 0x22b   :  { %v1915_v26 = vmul.f32 -1.442695, %v2468_v20  ;;  %v1916_v28 = vmul.f32 -1.442695, %v2484_v27 }
 0x22c   :  { %2556 = vpow2.f32 %v1914_v24 }
 0x22d   :  { %2558 = vpow2.f32 %v1915_v26 }
 0x22e   :  { %2560 = vpow2.f32 %v1916_v28 }
 0x22f   :  { %2562 = vtanh.f32 %v2483_v13 }
 0x236   :  { %v2557_v32 = vpop.eup %2556 }
 0x237   :  { %v2559_v1 = vpop.eup %2558  ;;  %v750_v33 = vadd.f32 1.0, %v2557_v32 }
 0x238   :  { %v756_v35 = vadd.f32 1.0, %v2559_v1  ;;  %v2561_v40 = vpop.eup %2560 }
 0x239   :  { %2564 = vrcp.f32 %v750_v33  ;;  %v2563_v37 = vpop.eup %2562  ;;  %v763_v53 = vadd.f32 1.0, %v2561_v40 }
 0x23a   :  { %2566 = vrcp.f32 %v756_v35 }
 0x23b   :  { %2568 = vrcp.f32 %v763_v53 }
 0x243   :  { %v2565_v45 = vpop.eup %2564 }
 0x244   :  { %v2567_v49 = vpop.eup %2566  ;;  %v767_v50 = vmul.f32 %v2565_v45, %v2563_v37 }
 0x245   :  { %v766_v57 = vmul.f32 %v2567_v49, %v3025_v46  ;;  %v2569_v5 = vpop.eup %2568 }
 0x247   :  { %v768_v62 = vadd.f32 %v767_v50, %v766_v57  ;;  %v959_v57 = vpop.permute.xlu1 %958 }
 0x248   :  { %vm960_vm11 = vcmp.eq.s32.totalorder %v959_v57, 1 }
 0x249   :  { %2570 = vtanh.f32 %v768_v62  ;;  %v3078_v2 = vsel %vm778_vm10, %v768_v62, %v3025_v46 }
 0x253   :  { %v2571_v10 = vpop.eup %2570 }
 0x254   :  { %v770_v11 = vmul.f32 %v2571_v10, %v2569_v5 }
 0x256   :  { %v3081_v15 = vsel %vm778_vm10, %v770_v11, %v3027_v54  ;;  %v781_v17 = vsel %vm778_vm10, %v770_v11, 0.0 }
 0x257   :  { %782 = vst [vmem:[#allocation9 + $0x8] sm:$0xff] %v781_v17  ;;  %848 = vmatmul.mubr.f32.vlgmr.msra.gmra.mrb[4].mxu0 %v3081_v15  ;;  %919 = vmatmul.mubr.f32.vlgmr.msra.gmra.mrb[4].mxu1 %v3081_v15 }
 0x258   :  { %2148 = vmatpush1.bf16.msra.mxu0 %v2814_v36  ;;  %2180 = vmatpush1.bf16.msra.mxu1 %v2817_v39 }
 0x259   :  { %2150 = vmatprep.subr.bf16.mxu0 %v2820_v43  ;;  %2182 = vmatprep.subr.bf16.mxu1 %v2826_v48 }
 0x25a   :  { %1029 = vmatprep.mubr.f32.mxu0 %v2744_v0  ;;  %1100 = vmatprep.mubr.f32.mxu1 %v2744_v0 }
 0x25c   :  { %2152 = vmatpush1.bf16.msra.mxu0 %v2830_v51  ;;  %2184 = vmatpush1.bf16.msra.mxu1 %v2834_v55 }
 0x25d   :  { %2154 = vmatprep.subr.bf16.mxu0 %v2838_v58  ;;  %2186 = vmatprep.subr.bf16.mxu1 %v2842_v61 }
 0x260   :  { %2156 = vmatpush1.bf16.msra.mxu0 %v2849_v3  ;;  %2188 = vmatpush1.bf16.msra.mxu1 %v2853_v6 }
 0x261   :  { %2158 = vmatprep.subr.bf16.mxu0 %v2857_v9  ;;  %2190 = vmatprep.subr.bf16.mxu1 %v2861_v12 }
 0x264   :  { %2160 = vmatpush1.bf16.msra.mxu0 %v2868_v16  ;;  %2192 = vmatpush1.bf16.msra.mxu1 %v2872_v19 }
 0x265   :  { %2162 = vmatprep.subr.bf16.mxu0 %v2876_v22  ;;  %2194 = vmatprep.subr.bf16.mxu1 %v2880_v25 }
 0x268   :  { %2164 = vmatpush1.bf16.msra.mxu0 %v2887_v29  ;;  %2196 = vmatpush1.bf16.msra.mxu1 %v2891_v34 }
 0x269   :  { %2166 = vmatprep.subr.bf16.mxu0 %v2895_v38  ;;  %2198 = vmatprep.subr.bf16.mxu1 %v2899_v42 }
 0x26c   :  { %2168 = vmatpush1.bf16.msra.mxu0 %v2906_v47  ;;  %2200 = vmatpush1.bf16.msra.mxu1 %v2910_v52 }
 0x26d   :  { %2170 = vmatprep.subr.bf16.mxu0 %v2914_v56  ;;  %2202 = vmatprep.subr.bf16.mxu1 %v2918_v60 }
 0x270   :  { %2172 = vmatpush1.bf16.msra.mxu0 %v2925_v4  ;;  %2204 = vmatpush1.bf16.msra.mxu1 %v2929_v8 }
 0x271   :  { %2174 = vmatprep.subr.bf16.mxu0 %v2938_v14  ;;  %2206 = vmatprep.subr.bf16.mxu1 %v2942_v18 }
 0x274   :  { %2176 = vmatpush1.bf16.msra.mxu0 %v2949_v21  ;;  %2208 = vmatpush1.bf16.msra.mxu1 %v2954_v23 }
 0x275   :  { %2210 = vmatprep.subr.bf16.mxu0 %v2807_v30  ;;  %2242 = vmatprep.subr.bf16.mxu1 %v2809_v31 }
 0x32a   :  { %v849_v46 = vpop.f32.mrb[4].mxu0  ;;  %v920_v54 = vpop.f32.mrb[4].mxu1 }
 0x32b   :  { %v2469_v20 = vadd.f32 %v849_v46, %v3013_v41  ;;  %v851_v24 = vpop.f32.mrb[5].mxu0  ;;  %v922_v26 = vpop.f32.mrb[5].mxu1  ;;  %v2485_v33 = vadd.f32 %v920_v54, %v3022_v7 }
 0x32c   :  { %v2470_v27 = vadd.f32 %v851_v24, %v3015_v44  ;;  %v2486_v32 = vadd.f32 %v922_v26, %v3019_v63 }
 0x32d   :  { %v1917_v28 = vmul.f32 -1.442695, %v2469_v20 }
 0x32e   :  { %v1918_v13 = vmul.f32 -1.442695, %v2470_v27  ;;  %v1919_v1 = vmul.f32 -1.442695, %v2486_v32 }
 0x32f   :  { %2572 = vpow2.f32 %v1917_v28 }
 0x330   :  { %2574 = vpow2.f32 %v1918_v13 }
 0x331   :  { %2576 = vpow2.f32 %v1919_v1 }
 0x332   :  { %2578 = vtanh.f32 %v2485_v33 }
 0x339   :  { %v2573_v35 = vpop.eup %2572 }
 0x33a   :  { %v2575_v40 = vpop.eup %2574  ;;  %v932_v37 = vadd.f32 1.0, %v2573_v35 }
 0x33b   :  { %v938_v45 = vadd.f32 1.0, %v2575_v40  ;;  %v2577_v49 = vpop.eup %2576 }
 0x33c   :  { %2580 = vrcp.f32 %v932_v37  ;;  %v2579_v50 = vpop.eup %2578  ;;  %v945_v62 = vadd.f32 1.0, %v2577_v49 }
 0x33d   :  { %2582 = vrcp.f32 %v938_v45 }
 0x33e   :  { %2584 = vrcp.f32 %v945_v62 }
 0x346   :  { %v2581_v53 = vpop.eup %2580 }
 0x347   :  { %v2583_v59 = vpop.eup %2582  ;;  %v949_v5 = vmul.f32 %v2581_v53, %v2579_v50 }
 0x348   :  { %v948_v10 = vmul.f32 %v2583_v59, %v3078_v2  ;;  %v2585_v46 = vpop.eup %2584 }
 0x34a   :  { %v950_v11 = vadd.f32 %v949_v5, %v948_v10 }
 0x34c   :  { %2586 = vtanh.f32 %v950_v11  ;;  %v3125_v17 = vsel %vm960_vm11, %v950_v11, %v3078_v2 }
 0x356   :  { %v2587_v54 = vpop.eup %2586 }
 0x357   :  { %v952_v20 = vmul.f32 %v2587_v54, %v2585_v46  ;;  %v1141_v54 = vpop.permute.xlu1 %1140 }
 0x358   :  { %vm1142_vm12 = vcmp.eq.s32.totalorder %v1141_v54, 1 }
 0x359   :  { %v3128_v24 = vsel %vm960_vm11, %v952_v20, %v3081_v15  ;;  %v963_v26 = vsel %vm960_vm11, %v952_v20, 0.0 }
 0x35a   :  { %964 = vst [vmem:[#allocation9 + $0x10] sm:$0xff] %v963_v26  ;;  %1030 = vmatmul.mubr.f32.vlgmr.msra.gmra.mrb[6].mxu0 %v3128_v24  ;;  %1101 = vmatmul.mubr.f32.vlgmr.msra.gmra.mrb[6].mxu1 %v3128_v24 }
 0x35b   :  { %2212 = vmatpush1.bf16.msra.mxu0 %v2814_v36  ;;  %2244 = vmatpush1.bf16.msra.mxu1 %v2817_v39 }
 0x35c   :  { %2214 = vmatprep.subr.bf16.mxu0 %v2820_v43  ;;  %2246 = vmatprep.subr.bf16.mxu1 %v2826_v48 }
 0x35d   :  { %1211 = vmatprep.mubr.f32.mxu0 %v2744_v0  ;;  %1282 = vmatprep.mubr.f32.mxu1 %v2744_v0 }
 0x35f   :  { %2216 = vmatpush1.bf16.msra.mxu0 %v2830_v51  ;;  %2248 = vmatpush1.bf16.msra.mxu1 %v2834_v55 }
 0x360   :  { %2218 = vmatprep.subr.bf16.mxu0 %v2838_v58  ;;  %2250 = vmatprep.subr.bf16.mxu1 %v2842_v61 }
 0x363   :  { %2220 = vmatpush1.bf16.msra.mxu0 %v2849_v3  ;;  %2252 = vmatpush1.bf16.msra.mxu1 %v2853_v6 }
 0x364   :  { %2222 = vmatprep.subr.bf16.mxu0 %v2857_v9  ;;  %2254 = vmatprep.subr.bf16.mxu1 %v2861_v12 }
 0x367   :  { %2224 = vmatpush1.bf16.msra.mxu0 %v2868_v16  ;;  %2256 = vmatpush1.bf16.msra.mxu1 %v2872_v19 }
 0x368   :  { %2226 = vmatprep.subr.bf16.mxu0 %v2876_v22  ;;  %2258 = vmatprep.subr.bf16.mxu1 %v2880_v25 }
 0x36b   :  { %2228 = vmatpush1.bf16.msra.mxu0 %v2887_v29  ;;  %2260 = vmatpush1.bf16.msra.mxu1 %v2891_v34 }
 0x36c   :  { %2230 = vmatprep.subr.bf16.mxu0 %v2895_v38  ;;  %2262 = vmatprep.subr.bf16.mxu1 %v2899_v42 }
 0x36f   :  { %2232 = vmatpush1.bf16.msra.mxu0 %v2906_v47  ;;  %2264 = vmatpush1.bf16.msra.mxu1 %v2910_v52 }
 0x370   :  { %2234 = vmatprep.subr.bf16.mxu0 %v2914_v56  ;;  %2266 = vmatprep.subr.bf16.mxu1 %v2918_v60 }
 0x373   :  { %2236 = vmatpush1.bf16.msra.mxu0 %v2925_v4  ;;  %2268 = vmatpush1.bf16.msra.mxu1 %v2929_v8 }
 0x374   :  { %2238 = vmatprep.subr.bf16.mxu0 %v2938_v14  ;;  %2270 = vmatprep.subr.bf16.mxu1 %v2942_v18 }
 0x377   :  { %2240 = vmatpush1.bf16.msra.mxu0 %v2949_v21  ;;  %2272 = vmatpush1.bf16.msra.mxu1 %v2954_v23 }
 0x378   :  { %2274 = vmatprep.subr.bf16.mxu0 %v2807_v30  ;;  %2306 = vmatprep.subr.bf16.mxu1 %v2809_v31 }
 0x42d   :  { %v1031_v2 = vpop.f32.mrb[6].mxu0  ;;  %v1102_v15 = vpop.f32.mrb[6].mxu1 }
 0x42e   :  { %v2471_v27 = vadd.f32 %v1031_v2, %v3013_v41  ;;  %v1033_v28 = vpop.f32.mrb[7].mxu0  ;;  %v1104_v13 = vpop.f32.mrb[7].mxu1  ;;  %v2487_v37 = vadd.f32 %v1102_v15, %v3022_v7 }
 0x42f   :  { %v2472_v32 = vadd.f32 %v1033_v28, %v3015_v44  ;;  %v2488_v35 = vadd.f32 %v1104_v13, %v3019_v63 }
 0x430   :  { %v1920_v1 = vmul.f32 -1.442695, %v2471_v27 }
 0x431   :  { %v1921_v33 = vmul.f32 -1.442695, %v2472_v32  ;;  %v1922_v40 = vmul.f32 -1.442695, %v2488_v35 }
 0x432   :  { %2588 = vpow2.f32 %v1920_v1 }
 0x433   :  { %2590 = vpow2.f32 %v1921_v33 }
 0x434   :  { %2592 = vpow2.f32 %v1922_v40 }
 0x435   :  { %2594 = vtanh.f32 %v2487_v37 }
 0x43c   :  { %v2589_v45 = vpop.eup %2588 }
 0x43d   :  { %v2591_v49 = vpop.eup %2590  ;;  %v1114_v50 = vadd.f32 1.0, %v2589_v45 }
 0x43e   :  { %v1120_v53 = vadd.f32 1.0, %v2591_v49  ;;  %v2593_v57 = vpop.eup %2592 }
 0x43f   :  { %2596 = vrcp.f32 %v1114_v50  ;;  %v2595_v59 = vpop.eup %2594  ;;  %v1127_v11 = vadd.f32 1.0, %v2593_v57 }
 0x440   :  { %2598 = vrcp.f32 %v1120_v53 }
 0x441   :  { %2600 = vrcp.f32 %v1127_v11 }
 0x449   :  { %v2597_v62 = vpop.eup %2596 }
 0x44a   :  { %v2599_v5 = vpop.eup %2598  ;;  %v1131_v10 = vmul.f32 %v2597_v62, %v2595_v59 }
 0x44b   :  { %v1130_v46 = vmul.f32 %v2599_v5, %v3125_v17  ;;  %v2601_v2 = vpop.eup %2600 }
 0x44d   :  { %v1132_v20 = vadd.f32 %v1131_v10, %v1130_v46 }
 0x44f   :  { %2602 = vtanh.f32 %v1132_v20  ;;  %v3172_v26 = vsel %vm1142_vm12, %v1132_v20, %v3125_v17 }
 0x459   :  { %v2603_v15 = vpop.eup %2602 }
 0x45a   :  { %v1134_v27 = vmul.f32 %v2603_v15, %v2601_v2  ;;  %v1323_v15 = vpop.permute.xlu0 %1322 }
 0x45b   :  { %vm1324_vm13 = vcmp.eq.s32.totalorder %v1323_v15, 1 }
 0x45c   :  { %v3175_v28 = vsel %vm1142_vm12, %v1134_v27, %v3128_v24  ;;  %v1145_v13 = vsel %vm1142_vm12, %v1134_v27, 0.0 }
 0x45d   :  { %1146 = vst [vmem:[#allocation9 + $0x18] sm:$0xff] %v1145_v13  ;;  %1212 = vmatmul.mubr.f32.vlgmr.msra.gmra.mrb[8].mxu0 %v3175_v28  ;;  %1283 = vmatmul.mubr.f32.vlgmr.msra.gmra.mrb[8].mxu1 %v3175_v28 }
 0x45e   :  { %2276 = vmatpush1.bf16.msra.mxu0 %v2814_v36  ;;  %2308 = vmatpush1.bf16.msra.mxu1 %v2817_v39 }
 0x45f   :  { %2278 = vmatprep.subr.bf16.mxu0 %v2820_v43  ;;  %2310 = vmatprep.subr.bf16.mxu1 %v2826_v48 }
 0x460   :  { %1393 = vmatprep.mubr.f32.mxu0 %v2744_v0  ;;  %1464 = vmatprep.mubr.f32.mxu1 %v2744_v0 }
 0x462   :  { %2280 = vmatpush1.bf16.msra.mxu0 %v2830_v51  ;;  %2312 = vmatpush1.bf16.msra.mxu1 %v2834_v55 }
 0x463   :  { %2282 = vmatprep.subr.bf16.mxu0 %v2838_v58  ;;  %2314 = vmatprep.subr.bf16.mxu1 %v2842_v61 }
 0x466   :  { %2284 = vmatpush1.bf16.msra.mxu0 %v2849_v3  ;;  %2316 = vmatpush1.bf16.msra.mxu1 %v2853_v6 }
 0x467   :  { %2286 = vmatprep.subr.bf16.mxu0 %v2857_v9  ;;  %2318 = vmatprep.subr.bf16.mxu1 %v2861_v12 }
 0x46a   :  { %2288 = vmatpush1.bf16.msra.mxu0 %v2868_v16  ;;  %2320 = vmatpush1.bf16.msra.mxu1 %v2872_v19 }
 0x46b   :  { %2290 = vmatprep.subr.bf16.mxu0 %v2876_v22  ;;  %2322 = vmatprep.subr.bf16.mxu1 %v2880_v25 }
 0x46e   :  { %2292 = vmatpush1.bf16.msra.mxu0 %v2887_v29  ;;  %2324 = vmatpush1.bf16.msra.mxu1 %v2891_v34 }
 0x46f   :  { %2294 = vmatprep.subr.bf16.mxu0 %v2895_v38  ;;  %2326 = vmatprep.subr.bf16.mxu1 %v2899_v42 }
 0x472   :  { %2296 = vmatpush1.bf16.msra.mxu0 %v2906_v47  ;;  %2328 = vmatpush1.bf16.msra.mxu1 %v2910_v52 }
 0x473   :  { %2298 = vmatprep.subr.bf16.mxu0 %v2914_v56  ;;  %2330 = vmatprep.subr.bf16.mxu1 %v2918_v60 }
 0x476   :  { %2300 = vmatpush1.bf16.msra.mxu0 %v2925_v4  ;;  %2332 = vmatpush1.bf16.msra.mxu1 %v2929_v8 }
 0x477   :  { %2302 = vmatprep.subr.bf16.mxu0 %v2938_v14  ;;  %2334 = vmatprep.subr.bf16.mxu1 %v2942_v18 }
 0x47a   :  { %2304 = vmatpush1.bf16.msra.mxu0 %v2949_v21  ;;  %2336 = vmatpush1.bf16.msra.mxu1 %v2954_v23 }
 0x47b   :  { %2338 = vmatprep.subr.bf16.mxu0 %v2807_v30  ;;  %2370 = vmatprep.subr.bf16.mxu1 %v2809_v31 }
 0x530   :  { %v1213_v17 = vpop.f32.mrb[8].mxu0  ;;  %v1284_v24 = vpop.f32.mrb[8].mxu1 }
 0x531   :  { %v2473_v32 = vadd.f32 %v1213_v17, %v3013_v41  ;;  %v1215_v1 = vpop.f32.mrb[9].mxu0  ;;  %v1286_v33 = vpop.f32.mrb[9].mxu1  ;;  %v2489_v50 = vadd.f32 %v1284_v24, %v3022_v7 }
 0x532   :  { %v2474_v35 = vadd.f32 %v1215_v1, %v3015_v44  ;;  %v2490_v45 = vadd.f32 %v1286_v33, %v3019_v63 }
 0x533   :  { %v1923_v40 = vmul.f32 -1.442695, %v2473_v32 }
 0x534   :  { %v1924_v37 = vmul.f32 -1.442695, %v2474_v35  ;;  %v1925_v49 = vmul.f32 -1.442695, %v2490_v45 }
 0x535   :  { %2604 = vpow2.f32 %v1923_v40 }
 0x536   :  { %2606 = vpow2.f32 %v1924_v37 }
 0x537   :  { %2608 = vpow2.f32 %v1925_v49 }
 0x538   :  { %2610 = vtanh.f32 %v2489_v50 }
 0x53f   :  { %v2605_v53 = vpop.eup %2604 }
 0x540   :  { %v2607_v57 = vpop.eup %2606  ;;  %v1296_v59 = vadd.f32 1.0, %v2605_v53 }
 0x541   :  { %v1302_v62 = vadd.f32 1.0, %v2607_v57  ;;  %v2609_v5 = vpop.eup %2608 }
 0x542   :  { %2612 = vrcp.f32 %v1296_v59  ;;  %v2611_v10 = vpop.eup %2610  ;;  %v1309_v20 = vadd.f32 1.0, %v2609_v5 }
 0x543   :  { %2614 = vrcp.f32 %v1302_v62 }
 0x544   :  { %2616 = vrcp.f32 %v1309_v20 }
 0x54c   :  { %v2613_v11 = vpop.eup %2612 }
 0x54d   :  { %v2615_v46 = vpop.eup %2614  ;;  %v1313_v54 = vmul.f32 %v2613_v11, %v2611_v10 }
 0x54e   :  { %v1312_v2 = vmul.f32 %v2615_v46, %v3172_v26  ;;  %v2617_v17 = vpop.eup %2616 }
 0x550   :  { %v1314_v27 = vadd.f32 %v1313_v54, %v1312_v2 }
 0x552   :  { %2618 = vtanh.f32 %v1314_v27  ;;  %v3219_v13 = vsel %vm1324_vm13, %v1314_v27, %v3172_v26  ;;  %v1505_v27 = vpop.permute.xlu1 %1504 }
 0x553   :  { %vm1506_vm14 = vcmp.eq.s32.totalorder %v1505_v27, 1 }
 0x55c   :  { %v2619_v24 = vpop.eup %2618 }
 0x55d   :  { %v1316_v32 = vmul.f32 %v2619_v24, %v2617_v17 }
 0x55f   :  { %v3222_v1 = vsel %vm1324_vm13, %v1316_v32, %v3175_v28  ;;  %v1327_v33 = vsel %vm1324_vm13, %v1316_v32, 0.0 }
 0x560   :  { %1328 = vst [vmem:[#allocation9 + $0x20] sm:$0xff] %v1327_v33  ;;  %1394 = vmatmul.mubr.f32.vlgmr.msra.gmra.mrb[10].mxu0 %v3222_v1  ;;  %1465 = vmatmul.mubr.f32.vlgmr.msra.gmra.mrb[10].mxu1 %v3222_v1 }
 0x561   :  { %2340 = vmatpush1.bf16.msra.mxu0 %v2814_v36  ;;  %2372 = vmatpush1.bf16.msra.mxu1 %v2817_v39 }
 0x562   :  { %2342 = vmatprep.subr.bf16.mxu0 %v2820_v43  ;;  %2374 = vmatprep.subr.bf16.mxu1 %v2826_v48 }
 0x563   :  { %1575 = vmatprep.mubr.f32.mxu0 %v2744_v0  ;;  %1646 = vmatprep.mubr.f32.mxu1 %v2744_v0 }
 0x565   :  { %2344 = vmatpush1.bf16.msra.mxu0 %v2830_v51  ;;  %2376 = vmatpush1.bf16.msra.mxu1 %v2834_v55 }
 0x566   :  { %2346 = vmatprep.subr.bf16.mxu0 %v2838_v58  ;;  %2378 = vmatprep.subr.bf16.mxu1 %v2842_v61 }
 0x569   :  { %2348 = vmatpush1.bf16.msra.mxu0 %v2849_v3  ;;  %2380 = vmatpush1.bf16.msra.mxu1 %v2853_v6 }
 0x56a   :  { %2350 = vmatprep.subr.bf16.mxu0 %v2857_v9  ;;  %2382 = vmatprep.subr.bf16.mxu1 %v2861_v12 }
 0x56d   :  { %2352 = vmatpush1.bf16.msra.mxu0 %v2868_v16  ;;  %2384 = vmatpush1.bf16.msra.mxu1 %v2872_v19 }
 0x56e   :  { %2354 = vmatprep.subr.bf16.mxu0 %v2876_v22  ;;  %2386 = vmatprep.subr.bf16.mxu1 %v2880_v25 }
 0x571   :  { %2356 = vmatpush1.bf16.msra.mxu0 %v2887_v29  ;;  %2388 = vmatpush1.bf16.msra.mxu1 %v2891_v34 }
 0x572   :  { %2358 = vmatprep.subr.bf16.mxu0 %v2895_v38  ;;  %2390 = vmatprep.subr.bf16.mxu1 %v2899_v42 }
 0x575   :  { %2360 = vmatpush1.bf16.msra.mxu0 %v2906_v47  ;;  %2392 = vmatpush1.bf16.msra.mxu1 %v2910_v52 }
 0x576   :  { %2362 = vmatprep.subr.bf16.mxu0 %v2914_v56  ;;  %2394 = vmatprep.subr.bf16.mxu1 %v2918_v60 }
 0x579   :  { %2364 = vmatpush1.bf16.msra.mxu0 %v2925_v4  ;;  %2396 = vmatpush1.bf16.msra.mxu1 %v2929_v8 }
 0x57a   :  { %2366 = vmatprep.subr.bf16.mxu0 %v2938_v14  ;;  %2398 = vmatprep.subr.bf16.mxu1 %v2942_v18 }
 0x57d   :  { %2368 = vmatpush1.bf16.msra.mxu0 %v2949_v21  ;;  %2400 = vmatpush1.bf16.msra.mxu1 %v2954_v23 }
 0x57e   :  { %2402 = vmatprep.subr.bf16.mxu0 %v2807_v30  ;;  %2434 = vmatprep.subr.bf16.mxu1 %v2809_v31 }
 0x633   :  { %v1395_v26 = vpop.f32.mrb[10].mxu0  ;;  %v1466_v28 = vpop.f32.mrb[10].mxu1 }
 0x634   :  { %v2475_v35 = vadd.f32 %v1395_v26, %v3013_v41  ;;  %v1397_v40 = vpop.f32.mrb[11].mxu0  ;;  %v1468_v37 = vpop.f32.mrb[11].mxu1  ;;  %v2491_v59 = vadd.f32 %v1466_v28, %v3022_v7 }
 0x635   :  { %v2476_v45 = vadd.f32 %v1397_v40, %v3015_v44  ;;  %v2492_v53 = vadd.f32 %v1468_v37, %v3019_v63 }
 0x636   :  { %v1926_v49 = vmul.f32 -1.442695, %v2475_v35 }
 0x637   :  { %v1927_v50 = vmul.f32 -1.442695, %v2476_v45  ;;  %v1928_v57 = vmul.f32 -1.442695, %v2492_v53 }
 0x638   :  { %2620 = vpow2.f32 %v1926_v49 }
 0x639   :  { %2622 = vpow2.f32 %v1927_v50 }
 0x63a   :  { %2624 = vpow2.f32 %v1928_v57 }
 0x63b   :  { %2626 = vtanh.f32 %v2491_v59 }
 0x642   :  { %v2621_v30 = vpop.eup %2620 }
 0x643   :  { %v2623_v62 = vpop.eup %2622  ;;  %v1478_v31 = vadd.f32 1.0, %v2621_v30 }
 0x644   :  { %v1484_v5 = vadd.f32 1.0, %v2623_v62  ;;  %v2625_v10 = vpop.eup %2624 }
 0x645   :  { %2628 = vrcp.f32 %v1478_v31  ;;  %v2627_v11 = vpop.eup %2626  ;;  %v1491_v2 = vadd.f32 1.0, %v2625_v10 }
 0x646   :  { %2630 = vrcp.f32 %v1484_v5 }
 0x647   :  { %2632 = vrcp.f32 %v1491_v2 }
 0x64f   :  { %v2629_v46 = vpop.eup %2628 }
 0x650   :  { %v2631_v54 = vpop.eup %2630  ;;  %v1495_v20 = vmul.f32 %v2629_v46, %v2627_v11 }
 0x651   :  { %v1494_v15 = vmul.f32 %v2631_v54, %v3219_v13  ;;  %v2633_v32 = vpop.eup %2632 }
 0x653   :  { %v1496_v17 = vadd.f32 %v1495_v20, %v1494_v15 }
 0x655   :  { %2634 = vtanh.f32 %v1496_v17  ;;  %v3266_v24 = vsel %vm1506_vm14, %v1496_v17, %v3219_v13 }
 0x65f   :  { %v2635_v33 = vpop.eup %2634 }
 0x660   :  { %v1498_v26 = vmul.f32 %v2635_v33, %v2633_v32 }
 0x662   :  { %v3269_v28 = vsel %vm1506_vm14, %v1498_v26, %v3222_v1  ;;  %v1509_v35 = vsel %vm1506_vm14, %v1498_v26, 0.0 }
 0x663   :  { %1510 = vst [vmem:[#allocation9 + $0x28] sm:$0xff] %v1509_v35  ;;  %1576 = vmatmul.mubr.f32.vlgmr.msra.gmra.mrb[12].mxu0 %v3269_v28  ;;  %1647 = vmatmul.mubr.f32.vlgmr.msra.gmra.mrb[12].mxu1 %v3269_v28 }
 0x664   :  { %2404 = vmatpush1.bf16.msra.mxu0 %v2814_v36  ;;  %2436 = vmatpush1.bf16.msra.mxu1 %v2817_v39 }
 0x665   :  { %2406 = vmatprep.subr.bf16.mxu0 %v2820_v43  ;;  %2438 = vmatprep.subr.bf16.mxu1 %v2826_v48 }
 0x666   :  { %1757 = vmatprep.mubr.f32.mxu0 %v2744_v0  ;;  %1828 = vmatprep.mubr.f32.mxu1 %v2744_v0 }
 0x668   :  { %2408 = vmatpush1.bf16.msra.mxu0 %v2830_v51  ;;  %2440 = vmatpush1.bf16.msra.mxu1 %v2834_v55 }
 0x669   :  { %2410 = vmatprep.subr.bf16.mxu0 %v2838_v58  ;;  %2442 = vmatprep.subr.bf16.mxu1 %v2842_v61 }
 0x66c   :  { %2412 = vmatpush1.bf16.msra.mxu0 %v2849_v3  ;;  %2444 = vmatpush1.bf16.msra.mxu1 %v2853_v6 }
 0x66d   :  { %2414 = vmatprep.subr.bf16.mxu0 %v2857_v9  ;;  %2446 = vmatprep.subr.bf16.mxu1 %v2861_v12 }
 0x670   :  { %2416 = vmatpush1.bf16.msra.mxu0 %v2868_v16  ;;  %2448 = vmatpush1.bf16.msra.mxu1 %v2872_v19 }
 0x671   :  { %2418 = vmatprep.subr.bf16.mxu0 %v2876_v22  ;;  %2450 = vmatprep.subr.bf16.mxu1 %v2880_v25 }
 0x674   :  { %2420 = vmatpush1.bf16.msra.mxu0 %v2887_v29  ;;  %2452 = vmatpush1.bf16.msra.mxu1 %v2891_v34 }
 0x675   :  { %2422 = vmatprep.subr.bf16.mxu0 %v2895_v38  ;;  %2454 = vmatprep.subr.bf16.mxu1 %v2899_v42 }
 0x678   :  { %2424 = vmatpush1.bf16.msra.mxu0 %v2906_v47  ;;  %2456 = vmatpush1.bf16.msra.mxu1 %v2910_v52  ;;  %v1687_v47 = vpop.permute.xlu0 %1686 }
 0x679   :  { %2426 = vmatprep.subr.bf16.mxu0 %v2914_v56  ;;  %2458 = vmatprep.subr.bf16.mxu1 %v2918_v60  ;;  %vm1688_vm15 = vcmp.eq.s32.totalorder %v1687_v47, 1 }
 0x67c   :  { %2428 = vmatpush1.bf16.msra.mxu0 %v2925_v4  ;;  %2460 = vmatpush1.bf16.msra.mxu1 %v2929_v8 }
 0x67d   :  { %2430 = vmatprep.subr.bf16.mxu0 %v2938_v14  ;;  %2462 = vmatprep.subr.bf16.mxu1 %v2942_v18 }
 0x680   :  { %2432 = vmatpush1.bf16.msra.mxu0 %v2949_v21  ;;  %2464 = vmatpush1.bf16.msra.mxu1 %v2954_v23 }
 0x736   :  { %v1577_v0 = vpop.f32.mrb[12].mxu0  ;;  %v1648_v36 = vpop.f32.mrb[12].mxu1 }
 0x737   :  { %v2477_v39 = vadd.f32 %v1577_v0, %v3013_v41  ;;  %v1579_v43 = vpop.f32.mrb[13].mxu0  ;;  %v1650_v48 = vpop.f32.mrb[13].mxu1  ;;  %v2493_v6 = vadd.f32 %v1648_v36, %v3022_v7 }
 0x738   :  { %v2478_v51 = vadd.f32 %v1579_v43, %v3015_v44  ;;  %v2494_v61 = vadd.f32 %v1650_v48, %v3019_v63 }
 0x739   :  { %v1929_v55 = vmul.f32 -1.442695, %v2477_v39 }
 0x73a   :  { %v1930_v58 = vmul.f32 -1.442695, %v2478_v51  ;;  %v1931_v3 = vmul.f32 -1.442695, %v2494_v61 }
 0x73b   :  { %2636 = vpow2.f32 %v1929_v55 }
 0x73c   :  { %2638 = vpow2.f32 %v1930_v58 }
 0x73d   :  { %2640 = vpow2.f32 %v1931_v3 }
 0x73e   :  { %2642 = vtanh.f32 %v2493_v6 }
 0x745   :  { %v2637_v9 = vpop.eup %2636 }
 0x746   :  { %v2639_v12 = vpop.eup %2638  ;;  %v1660_v16 = vadd.f32 1.0, %v2637_v9 }
 0x747   :  { %v1666_v19 = vadd.f32 1.0, %v2639_v12  ;;  %v2641_v22 = vpop.eup %2640 }
 0x748   :  { %2644 = vrcp.f32 %v1660_v16  ;;  %v2643_v25 = vpop.eup %2642  ;;  %v1673_v42 = vadd.f32 1.0, %v2641_v22 }
 0x749   :  { %2646 = vrcp.f32 %v1666_v19 }
 0x74a   :  { %2648 = vrcp.f32 %v1673_v42 }
 0x752   :  { %v2645_v29 = vpop.eup %2644 }
 0x753   :  { %v2647_v34 = vpop.eup %2646  ;;  %v1677_v38 = vmul.f32 %v2645_v29, %v2643_v25 }
 0x754   :  { %v1676_v52 = vmul.f32 %v2647_v34, %v3266_v24  ;;  %v2649_v4 = vpop.eup %2648 }
 0x756   :  { %v1678_v56 = vadd.f32 %v1677_v38, %v1676_v52 }
 0x758   :  { %2650 = vtanh.f32 %v1678_v56  ;;  %v1690_v60 = vsel %vm1688_vm15, %v1678_v56, %v3266_v24 }
 0x762   :  { %v2651_v8 = vpop.eup %2650 }
 0x763   :  { %v1680_v14 = vmul.f32 %v2651_v8, %v2649_v4 }
 0x765   :  { %v1689_v18 = vsel %vm1688_vm15, %v1680_v14, %v3269_v28  ;;  %v1691_v21 = vsel %vm1688_vm15, %v1680_v14, 0.0 }
 0x766   :  { %1692 = vst [vmem:[#allocation9 + $0x30] sm:$0xff] %v1691_v21  ;;  %1758 = vmatmul.mubr.f32.vlgmr.msra.gmra.mrb[14].mxu0 %v1689_v18  ;;  %1829 = vmatmul.mubr.f32.vlgmr.msra.gmra.mrb[14].mxu1 %v1689_v18 }
 0x839   :  { %v1759_v23 = vpop.f32.mrb[14].mxu0  ;;  %v1830_v13 = vpop.f32.mrb[14].mxu1 }
 0x83a   :  { %v2479_v1 = vadd.f32 %v1759_v23, %v3013_v41  ;;  %v1761_v40 = vpop.f32.mrb[15].mxu0  ;;  %v1832_v37 = vpop.f32.mrb[15].mxu1  ;;  %v2495_v59 = vadd.f32 %v1830_v13, %v3022_v7 }
 0x83b   :  { %v2480_v45 = vadd.f32 %v1761_v40, %v3015_v44  ;;  %v2496_v53 = vadd.f32 %v1832_v37, %v3019_v63  ;;  %v1869_v7 = vpop.permute.xlu1 %1868 }
 0x83c   :  { %v1932_v49 = vmul.f32 -1.442695, %v2479_v1  ;;  %vm1870_vm0 = vcmp.eq.s32.totalorder %v1869_v7, 1 }
 0x83d   :  { %v1933_v50 = vmul.f32 -1.442695, %v2480_v45  ;;  %v1934_v57 = vmul.f32 -1.442695, %v2496_v53 }
 0x83e   :  { %2652 = vpow2.f32 %v1932_v49 }
 0x83f   :  { %2654 = vpow2.f32 %v1933_v50 }
 0x840   :  { %2656 = vpow2.f32 %v1934_v57 }
 0x841   :  { %2658 = vtanh.f32 %v2495_v59 }
 0x848   :  { %v2653_v30 = vpop.eup %2652 }
 0x849   :  { %v2655_v62 = vpop.eup %2654  ;;  %v1842_v31 = vadd.f32 1.0, %v2653_v30 }
 0x84a   :  { %v1848_v5 = vadd.f32 1.0, %v2655_v62  ;;  %v2657_v41 = vpop.eup %2656 }
 0x84b   :  { %2660 = vrcp.f32 %v1842_v31  ;;  %v2659_v10 = vpop.eup %2658  ;;  %v1855_v54 = vadd.f32 1.0, %v2657_v41 }
 0x84c   :  { %2662 = vrcp.f32 %v1848_v5 }
 0x84d   :  { %2664 = vrcp.f32 %v1855_v54 }
 0x855   :  { %v2661_v44 = vpop.eup %2660 }
 0x856   :  { %v2663_v11 = vpop.eup %2662  ;;  %v1859_v46 = vmul.f32 %v2661_v44, %v2659_v10 }
 0x857   :  { %v1858_v20 = vmul.f32 %v2663_v11, %v1690_v60  ;;  %v2665_v63 = vpop.eup %2664 }
 0x859   :  { %v1860_v2 = vadd.f32 %v1859_v46, %v1858_v20 }
 0x85b   :  { %2666 = vtanh.f32 %v1860_v2 }
 0x865   :  { %v2667_v15 = vpop.eup %2666 }
 0x866   :  { %v1862_v27 = vmul.f32 %v2667_v15, %v2665_v63 }
 0x868   :  { %v1873_v17 = vsel %vm1870_vm0, %v1862_v27, 0.0 }
 0x869   :  { %1874 = vst [vmem:[#allocation9 + $0x38] sm:$0xff] %v1873_v17 }
 0x86a   :  { %2723 = shalt.err (!%p2720_p6)
}
 0x86b   :  { %s2724_s14 = scalar_lea.hbm %s3333_s5, 1024 }
 0x86c   :  { %p2725_p7 = scmp.ne.s32.totalorder %s3333_s5, %s2724_s14  ;;  %p2728_p8 = scmp.lt.u32.totalorder %s2724_s14, %s3333_s5 }
 0x86e   :  { %p2730_p9 = pnand %p2728_p8, %p2725_p7 }
 0x870   :  { %2733 = shalt.err (!%p2730_p9)
}
 0x871   :  { %s2747_s2 = smov 128   ;;  %s2748_s18 = smov 8  }
 0x872   :  { %1888 = dma.vmem_to_hbm [thread:$0]  %s1883_s10, 1024, %s3333_s5, [#allocation6], %s2747_s2, %s2747_s2, %s2748_s18  }
 0x873   :  { %2738 = dma.done.wait [#allocation6], 1024  }
 0x874   :  { %2739 = vsyncadd [#allocation6], 4294966272 }
 0x875   :  { %1892 = vsyncpa [#allocation5], 1 }
 0x876   :  { %1893 = vsyncpa [#allocation8], 1 }
 0x877   :  { %1894 = vsyncpa [#allocation6], 1 }

</bundles_post_ra>
